<compile_context>
chip_gen: v6e
topology: v6e:2x2x1
jax: 0.10.0
libtpu: 0.0.40
codegen_flags: <defaults>
</compile_context>

<pallas_src>
import jax
import jax.numpy as jnp
from jax.experimental import pallas as pl
from jax.experimental.pallas import tpu as pltpu


def _round_up(x, m):
    return (x + m - 1) // m * m


def _pick_tile_k(d_pad, max_tk):
    """Largest multiple-of-128 divisor of d_pad that is <= max_tk (>=128)."""
    m = d_pad // 128
    cap = max(1, max_tk // 128)
    best = 1
    for div in range(1, m + 1):
        if m % div == 0 and div <= cap:
            best = div
    return best * 128


def _pick_tile_m(n, max_tm, r_pad, x_itemsize, w_itemsize):
    """Pick tm minimizing per-K-column HBM traffic (x padding vs w6 re-streaming)."""
    n8 = _round_up(n, 8)
    cap = min(max_tm, n8)
    if n >= 16:
        # Guarantee >=2 M blocks so the "parallel" axis can feed both v7x
        # TensorCores (harmless on single-TC v5e/v6e).
        cap = min(cap, _round_up((n + 1) // 2, 8))
    cap = max(cap, 8)
    cands, t = [], 8
    while t < cap:
        cands.append(t)
        t *= 2
    cands.append(cap)
    best_t, best_cost = None, None
    for t in cands:
        n_pad = _round_up(n, t)
        m_blocks = n_pad // t
        cost = n_pad * x_itemsize + m_blocks * r_pad * w_itemsize
        if best_cost is None or cost < best_cost or (cost == best_cost and t > best_t):
            best_t, best_cost = t, cost
    return best_t


def _vmem_capacity_bytes():
    try:
        return int(pltpu.get_tpu_info().vmem_capacity_bytes)
    except Exception:
        return 64 << 20  # conservative fallback: assume v7x (smallest VMEM)


def prepare_nos_head_params(w6, b6, w7, b7, *, compute_dtype=jnp.bfloat16):
    """One-time weight prep (hoisted out of the per-call path).

    Transposes the PyTorch-layout weights to K-major, zero-pads to (8,128)
    multiples and casts to the compute dtype.  Call once at model init.
    """
    rep, d_in = w6.shape
    d_pad = _round_up(d_in, 128)
    r_pad = _round_up(rep, 128)
    w6_p = jnp.zeros((d_pad, r_pad), compute_dtype).at[:d_in, :rep].set(
        w6.T.astype(compute_dtype))
    w7_p = jnp.zeros((r_pad, r_pad), compute_dtype).at[:rep, :rep].set(
        w7.T.astype(compute_dtype))
    b6_p = jnp.zeros((1, r_pad), jnp.float32).at[0, :rep].set(b6.astype(jnp.float32))
    b7_p = jnp.zeros((1, r_pad), jnp.float32).at[0, :rep].set(b7.astype(jnp.float32))
    return {"w6": w6_p, "b6": b6_p, "w7": w7_p, "b7": b7_p,
            "d_in": d_in, "rep": rep, "d_pad": d_pad, "r_pad": r_pad}


def _nos_head_kernel_fused_out(x_ref, w6_ref, b6_ref, w7_ref, b7_ref, o_ref):
    """f32-output variant: o_ref doubles as the fc6 accumulator (resident across K)."""
    k = pl.program_id(1)

    @pl.when(k == 0)
    def _init():
        o_ref[...] = jnp.zeros_like(o_ref)

    # Cast the activation tile to the weight dtype in-kernel; x stays f32 in
    # HBM so the wrapper never writes a padded/cast copy of it.
    o_ref[...] += jnp.dot(x_ref[...].astype(w6_ref.dtype), w6_ref[...],
                          preferred_element_type=jnp.float32)

    @pl.when(k == pl.num_programs(1) - 1)
    def _finalize():
        h = jnp.maximum(o_ref[...] + b6_ref[...], 0.0)
        h2 = jnp.dot(h.astype(w7_ref.dtype), w7_ref[...],
                     preferred_element_type=jnp.float32)
        o_ref[...] = jnp.maximum(h2 + b7_ref[...], 0.0)


def _nos_head_kernel_scratch(x_ref, w6_ref, b6_ref, w7_ref, b7_ref, o_ref, acc_ref):
    """Variant with a separate f32 accumulator (used when output dtype != f32)."""
    k = pl.program_id(1)

    @pl.when(k == 0)
    def _init():
        acc_ref[...] = jnp.zeros_like(acc_ref)

    acc_ref[...] += jnp.dot(x_ref[...].astype(w6_ref.dtype), w6_ref[...],
                            preferred_element_type=jnp.float32)

    @pl.when(k == pl.num_programs(1) - 1)
    def _finalize():
        h = jnp.maximum(acc_ref[...] + b6_ref[...], 0.0)
        h2 = jnp.dot(h.astype(w7_ref.dtype), w7_ref[...],
                     preferred_element_type=jnp.float32)
        o_ref[...] = jnp.maximum(h2 + b7_ref[...], 0.0).astype(o_ref.dtype)


def _maybe_buffered_spec(shape, index_map, depth):
    """BlockSpec with a pipeline-depth hint; falls back if unsupported."""
    if depth != 2 and hasattr(pl, "Buffered"):
        try:
            return pl.BlockSpec(shape, index_map, pipeline_mode=pl.Buffered(depth))
        except TypeError:
            pass
    return pl.BlockSpec(shape, index_map)


def nos_head_forward(x_nchw, params, *, tile_m=256, tile_k=2048,
                     stream_depth=2, out_dtype=None):
    """Pallas implementation of nos_head.forward.

    x_nchw : (N, C, H, W), any float dtype (kept as-is in HBM; cast in-kernel)
    params : output of prepare_nos_head_params (K-major padded weights)
    returns: (N, representation_size) in out_dtype (default: x dtype)
    """
    n = x_nchw.shape[0]
    d_in, rep = params["d_in"], params["rep"]
    d_pad, r_pad = params["d_pad"], params["r_pad"]
    w6_p, b6_p, w7_p, b7_p = params["w6"], params["b6"], params["w7"], params["b7"]

    if out_dtype is None:
        out_dtype = x_nchw.dtype
    f32_out = jnp.dtype(out_dtype) == jnp.dtype(jnp.float32)

    # flatten(start_dim=1): pure glue, row-major like torch.flatten.
    x2d = x_nchw.reshape(n, d_in)

    x_itemsize = jnp.dtype(x2d.dtype).itemsize
    w_itemsize = jnp.dtype(w6_p.dtype).itemsize
    o_itemsize = jnp.dtype(out_dtype).itemsize

    # ---- tile selection (tk divides d_pad -> no wasted K padding) --------
    tk = _pick_tile_k(d_pad, max(128, tile_k))
    tm = _pick_tile_m(n, max(8, tile_m), r_pad, x_itemsize, w_itemsize)

    # Generation-aware VMEM budget + auto-shrink guard (instead of a blind clamp).
    vmem_budget = int(0.75 * _vmem_capacity_bytes())

    def vmem_bytes(tm_, tk_):
        return (stream_depth * tm_ * tk_ * x_itemsize      # x tiles (streamed)
                + stream_depth * tk_ * r_pad * w_itemsize  # w6 tiles (streamed)
                + r_pad * r_pad * w_itemsize                # w7 (resident, 1 buf)
                + 2 * r_pad * 4                             # biases (resident f32)
                + 2 * tm_ * r_pad * o_itemsize              # output tiles
                + (0 if f32_out else tm_ * r_pad * 4))      # f32 acc scratch

    while vmem_bytes(tm, tk) > vmem_budget:
        if tk > 128:
            tk = _pick_tile_k(d_pad, tk // 2)
        elif tm > 8:
            tm = max(8, tm // 2)
        else:
            break

    n_pad = _round_up(n, tm)

    # ---- x prep: zero-pad ONLY if needed; never cast in the wrapper ------
    if n_pad == n and d_pad == d_in:
        x_p = x2d
    else:
        x_p = jnp.zeros((n_pad, d_pad), x2d.dtype).at[:n, :d_in].set(x2d)

    grid = (n_pad // tm, d_pad // tk)
    vmem_limit = min(vmem_budget,
                     max(int(1.25 * vmem_bytes(tm, tk)) + (4 << 20), 16 << 20))

    def run(single_buffer_residents):
        resid_depth = 1 if single_buffer_residents else 2
        in_specs = [
            _maybe_buffered_spec((tm, tk), lambda i, k: (i, k), stream_depth),     # x
            _maybe_buffered_spec((tk, r_pad), lambda i, k: (k, 0), stream_depth),  # w6
            _maybe_buffered_spec((1, r_pad), lambda i, k: (0, 0), resid_depth),    # b6
            _maybe_buffered_spec((r_pad, r_pad), lambda i, k: (0, 0), resid_depth),# w7
            _maybe_buffered_spec((1, r_pad), lambda i, k: (0, 0), resid_depth),    # b7
        ]
        kernel = _nos_head_kernel_fused_out if f32_out else _nos_head_kernel_scratch
        scratch = [] if f32_out else [pltpu.VMEM((tm, r_pad), jnp.float32)]
        return pl.pallas_call(
            kernel,
            out_shape=jax.ShapeDtypeStruct((n_pad, r_pad), out_dtype),
            grid_spec=pltpu.PrefetchScalarGridSpec(
                num_scalar_prefetch=0,
                grid=grid,
                in_specs=in_specs,
                out_specs=pl.BlockSpec((tm, r_pad), lambda i, k: (i, 0)),
                scratch_shapes=scratch,
            ),
            compiler_params=pltpu.CompilerParams(
                dimension_semantics=("parallel", "arbitrary"),
                vmem_limit_bytes=vmem_limit,
            ),
        )(x_p, w6_p, b6_p, w7_p, b7_p)

    try:
        out_p = run(True)
    except Exception:
        # Fallback if this Pallas build rejects single-buffered resident inputs.
        out_p = run(False)

    return out_p[:n, :rep]


def _reference(x_nchw, w6, b6, w7, b7):
    x = x_nchw.reshape(x_nchw.shape[0], -1)
    h = jax.nn.relu(x @ w6.T + b6)
    return jax.nn.relu(h @ w7.T + b7)


if __name__ == "__main__":
    key = jax.random.PRNGKey(0)
    kx, k6w, k6b, k7w, k7b = jax.random.split(key, 5)

    # Small shapes consistent with the module; D_IN = 1024 so tile_k=512 below
    # exercises the K-reduction grid.
    N, C, H, W = 2, 4, 16, 16
    D_IN = C * H * W
    REP = 32   # padded to 128 lanes inside the kernel, sliced back after

    x = jax.random.normal(kx, (N, C, H, W), dtype=jnp.float32)
    w6 = jax.random.normal(k6w, (REP, D_IN), dtype=jnp.float32) * 0.05
    b6 = jax.random.normal(k6b, (REP,), dtype=jnp.float32) * 0.05
    w7 = jax.random.normal(k7w, (REP, REP), dtype=jnp.float32) * 0.05
    b7 = jax.random.normal(k7b, (REP,), dtype=jnp.float32) * 0.05

    ref = _reference(x, w6, b6, w7, b7)

    # f32 compute path (validation only): tight tolerance, single K step.
    params_f32 = prepare_nos_head_params(w6, b6, w7, b7, compute_dtype=jnp.float32)
    out_f32 = jax.block_until_ready(nos_head_forward(x, params_f32))
    assert out_f32.shape == (N, REP), out_f32.shape
    assert jnp.allclose(out_f32, ref, atol=1e-4, rtol=1e-4), "f32 mismatch"

    # f32 path with a forced K reduction (two K tiles of 512).
    out_f32_k = jax.block_until_ready(nos_head_forward(x, params_f32, tile_k=512))
    assert jnp.allclose(out_f32_k, ref, atol=1e-4, rtol=1e-4), "f32 K-split mismatch"

    # bf16 operand path (default perf configuration on all generations): both
    # matmul operands are bf16 (x tile + h cast in-kernel), f32 accumulate and
    # f32 epilogue -> looser tolerance.
    params_bf16 = prepare_nos_head_params(w6, b6, w7, b7, compute_dtype=jnp.bfloat16)
    out_bf16 = jax.block_until_ready(nos_head_forward(x, params_bf16))
    assert out_bf16.shape == (N, REP), out_bf16.shape
    assert jnp.allclose(out_bf16, ref, atol=5e-2, rtol=5e-2), "bf16 mismatch"

    # Optional bf16 output dtype (exercises the scratch-accumulator kernel and
    # halves output writeback if the consumer accepts bf16).
    out_bf16o = jax.block_until_ready(
        nos_head_forward(x, params_bf16, out_dtype=jnp.bfloat16))
    assert out_bf16o.dtype == jnp.bfloat16
    assert jnp.allclose(out_bf16o.astype(jnp.float32), ref, atol=5e-2, rtol=5e-2), \
        "bf16-out mismatch"

    print("KERNEL_OK")
</pallas_src>

<mosaic_0001>
module attributes {stable_mosaic.version = 11 : i64} {
  func.func @_nos_head_kernel_fused_out(%arg0: i32, %arg1: i32, %arg2: memref<8x1024xf32, #tpu.memory_space<vmem>>, %arg3: memref<1024x128xf32, #tpu.memory_space<vmem>>, %arg4: memref<1x128xf32, #tpu.memory_space<vmem>>, %arg5: memref<128x128xf32, #tpu.memory_space<vmem>>, %arg6: memref<1x128xf32, #tpu.memory_space<vmem>>, %arg7: memref<8x128xf32, #tpu.memory_space<vmem>>) attributes {dimension_semantics = [#tpu.dimension_semantics<parallel>, #tpu.dimension_semantics<arbitrary>], iteration_bounds = array<i64: 1, 1>, scalar_prefetch = 0 : i64, scratch_operands = 0 : i64, tpu.core_type = #tpu.core_type<tc>, window_params = [{transform_indices = @transform_0, window_bounds = array<i64: 8, 1024>}, {transform_indices = @transform_1, window_bounds = array<i64: 1024, 128>}, {pipeline_mode = #tpu.pipeline_mode<synchronous>, transform_indices = @transform_2, window_bounds = array<i64: 1, 128>}, {pipeline_mode = #tpu.pipeline_mode<synchronous>, transform_indices = @transform_3, window_bounds = array<i64: 128, 128>}, {pipeline_mode = #tpu.pipeline_mode<synchronous>, transform_indices = @transform_4, window_bounds = array<i64: 1, 128>}, {transform_indices = @transform_5, window_bounds = array<i64: 8, 128>}]} {
    %c0_i32 = arith.constant 0 : i32
    %0 = arith.cmpi eq, %arg1, %c0_i32 : i32
    %1 = arith.extui %0 : i1 to i32
    %c0_i32_0 = arith.constant 0 : i32
    %2 = arith.cmpi ne, %1, %c0_i32_0 : i32
    scf.if %2 {
      %cst_10 = arith.constant 0.000000e+00 : f32
      %12 = vector.broadcast %cst_10 : f32 to vector<8x128xf32>
      %c0_11 = arith.constant 0 : index
      %c0_12 = arith.constant 0 : index
      %13 = vector.load %arg7[%c0_11, %c0_12] : memref<8x128xf32, #tpu.memory_space<vmem>>, vector<8x128xf32>
      tpu.vector_store %arg7[%c0_11, %c0_12], %12 {strides = array<i32>} : memref<8x128xf32, #tpu.memory_space<vmem>>, vector<8x128xf32>,
    } else {
    }
    %c0 = arith.constant 0 : index
    %c0_1 = arith.constant 0 : index
    %3 = vector.load %arg7[%c0, %c0_1] : memref<8x128xf32, #tpu.memory_space<vmem>>, vector<8x128xf32>
    %c0_2 = arith.constant 0 : index
    %c0_3 = arith.constant 0 : index
    %4 = vector.load %arg2[%c0_2, %c0_3] : memref<8x1024xf32, #tpu.memory_space<vmem>>, vector<8x1024xf32>
    %c0_4 = arith.constant 0 : index
    %c0_5 = arith.constant 0 : index
    %5 = vector.load %arg3[%c0_4, %c0_5] : memref<1024x128xf32, #tpu.memory_space<vmem>>, vector<1024x128xf32>
    %cst = arith.constant dense<0.000000e+00> : vector<8x128xf32>
    %6 = tpu.matmul %4, %5, %cst {dimension_numbers = #tpu.dot_dimension_numbers<[1], [0], [0], [1], [0, 0, 1, 1], [], []>} : vector<8x1024xf32>, vector<1024x128xf32>, vector<8x128xf32> -> vector<8x128xf32>
    %7 = arith.addf %3, %6 : vector<8x128xf32>
    %c0_6 = arith.constant 0 : index
    %c0_7 = arith.constant 0 : index
    %8 = vector.load %arg7[%c0_6, %c0_7] : memref<8x128xf32, #tpu.memory_space<vmem>>, vector<8x128xf32>
    tpu.vector_store %arg7[%c0_6, %c0_7], %7 {strides = array<i32>} : memref<8x128xf32, #tpu.memory_space<vmem>>, vector<8x128xf32>,
    %c0_i32_8 = arith.constant 0 : i32
    %9 = arith.cmpi eq, %arg1, %c0_i32_8 : i32
    %10 = arith.extui %9 : i1 to i32
    %c0_i32_9 = arith.constant 0 : i32
    %11 = arith.cmpi ne, %10, %c0_i32_9 : i32
    scf.if %11 {
      %c0_10 = arith.constant 0 : index
      %c0_11 = arith.constant 0 : index
      %12 = vector.load %arg7[%c0_10, %c0_11] : memref<8x128xf32, #tpu.memory_space<vmem>>, vector<8x128xf32>
      %c0_12 = arith.constant 0 : index
      %c0_13 = arith.constant 0 : index
      %13 = vector.load %arg4[%c0_12, %c0_13] : memref<1x128xf32, #tpu.memory_space<vmem>>, vector<1x128xf32>
      %14 = vector.broadcast %13 : vector<1x128xf32> to vector<8x128xf32>
      %15 = arith.addf %12, %14 : vector<8x128xf32>
      %cst_14 = arith.constant 0.000000e+00 : f32
      %16 = vector.broadcast %cst_14 : f32 to vector<8x128xf32>
      %17 = arith.maximumf %15, %16 : vector<8x128xf32>
      %c0_15 = arith.constant 0 : index
      %c0_16 = arith.constant 0 : index
      %18 = vector.load %arg5[%c0_15, %c0_16] : memref<128x128xf32, #tpu.memory_space<vmem>>, vector<128x128xf32>
      %cst_17 = arith.constant dense<0.000000e+00> : vector<8x128xf32>
      %19 = tpu.matmul %17, %18, %cst_17 {dimension_numbers = #tpu.dot_dimension_numbers<[1], [0], [0], [1], [0, 0, 1, 1], [], []>} : vector<8x128xf32>, vector<128x128xf32>, vector<8x128xf32> -> vector<8x128xf32>
      %c0_18 = arith.constant 0 : index
      %c0_19 = arith.constant 0 : index
      %20 = vector.load %arg6[%c0_18, %c0_19] : memref<1x128xf32, #tpu.memory_space<vmem>>, vector<1x128xf32>
      %21 = vector.broadcast %20 : vector<1x128xf32> to vector<8x128xf32>
      %22 = arith.addf %19, %21 : vector<8x128xf32>
      %cst_20 = arith.constant 0.000000e+00 : f32
      %23 = vector.broadcast %cst_20 : f32 to vector<8x128xf32>
      %24 = arith.maximumf %22, %23 : vector<8x128xf32>
      %c0_21 = arith.constant 0 : index
      %c0_22 = arith.constant 0 : index
      %25 = vector.load %arg7[%c0_21, %c0_22] : memref<8x128xf32, #tpu.memory_space<vmem>>, vector<8x128xf32>
      tpu.vector_store %arg7[%c0_21, %c0_22], %24 {strides = array<i32>} : memref<8x128xf32, #tpu.memory_space<vmem>>, vector<8x128xf32>,
    } else {
    }
    return
  }
  func.func @transform_0(%arg0: i32, %arg1: i32) -> (i32, i32) {
    %c0_i32 = arith.constant 0 : i32
    return %arg0, %arg1 : i32, i32
  }
  func.func @transform_1(%arg0: i32, %arg1: i32) -> (i32, i32) {
    %c0_i32 = arith.constant 0 : i32
    %c0_i32_0 = arith.constant 0 : i32
    return %arg1, %c0_i32 : i32, i32
  }
  func.func @transform_2(%arg0: i32, %arg1: i32) -> (i32, i32) {
    %c0_i32 = arith.constant 0 : i32
    %c0_i32_0 = arith.constant 0 : i32
    %c0_i32_1 = arith.constant 0 : i32
    return %c0_i32, %c0_i32_0 : i32, i32
  }
  func.func @transform_3(%arg0: i32, %arg1: i32) -> (i32, i32) {
    %c0_i32 = arith.constant 0 : i32
    %c0_i32_0 = arith.constant 0 : i32
    %c0_i32_1 = arith.constant 0 : i32
    return %c0_i32, %c0_i32_0 : i32, i32
  }
  func.func @transform_4(%arg0: i32, %arg1: i32) -> (i32, i32) {
    %c0_i32 = arith.constant 0 : i32
    %c0_i32_0 = arith.constant 0 : i32
    %c0_i32_1 = arith.constant 0 : i32
    return %c0_i32, %c0_i32_0 : i32, i32
  }
  func.func @transform_5(%arg0: i32, %arg1: i32) -> (i32, i32) {
    %c0_i32 = arith.constant 0 : i32
    %c0_i32_0 = arith.constant 0 : i32
    return %arg0, %c0_i32 : i32, i32
  }
}

module attributes {stable_mosaic.version = 11 : i64} {
  func.func @_nos_head_kernel_fused_out(%arg0: i32, %arg1: i32, %arg2: memref<8x1024xf32, #tpu.memory_space<vmem>>, %arg3: memref<1024x128xf32, #tpu.memory_space<vmem>>, %arg4: memref<1x128xf32, #tpu.memory_space<vmem>>, %arg5: memref<128x128xf32, #tpu.memory_space<vmem>>, %arg6: memref<1x128xf32, #tpu.memory_space<vmem>>, %arg7: memref<8x128xf32, #tpu.memory_space<vmem>>) attributes {dimension_semantics = [#tpu.dimension_semantics<parallel>, #tpu.dimension_semantics<arbitrary>], iteration_bounds = array<i64: 1, 1>, scalar_prefetch = 0 : i64, scratch_operands = 0 : i64, tpu.core_type = #tpu.core_type<tc>, window_params = [{transform_indices = @transform_0, window_bounds = array<i64: 8, 1024>}, {transform_indices = @transform_1, window_bounds = array<i64: 1024, 128>}, {pipeline_mode = #tpu.pipeline_mode<synchronous>, transform_indices = @transform_2, window_bounds = array<i64: 1, 128>}, {pipeline_mode = #tpu.pipeline_mode<synchronous>, transform_indices = @transform_3, window_bounds = array<i64: 128, 128>}, {pipeline_mode = #tpu.pipeline_mode<synchronous>, transform_indices = @transform_4, window_bounds = array<i64: 1, 128>}, {transform_indices = @transform_5, window_bounds = array<i64: 8, 128>}]} {
    %c0_i32 = arith.constant 0 : i32
    %0 = arith.cmpi eq, %arg1, %c0_i32 : i32
    %1 = arith.extui %0 : i1 to i32
    %c0_i32_0 = arith.constant 0 : i32
    %2 = arith.cmpi ne, %1, %c0_i32_0 : i32
    scf.if %2 {
      %cst_10 = arith.constant 0.000000e+00 : f32
      %12 = vector.broadcast %cst_10 : f32 to vector<8x128xf32>
      %c0_11 = arith.constant 0 : index
      %c0_12 = arith.constant 0 : index
      %13 = vector.load %arg7[%c0_11, %c0_12] : memref<8x128xf32, #tpu.memory_space<vmem>>, vector<8x128xf32>
      tpu.vector_store %arg7[%c0_11, %c0_12], %12 {strides = array<i32>} : memref<8x128xf32, #tpu.memory_space<vmem>>, vector<8x128xf32>,
    } else {
    }
    %c0 = arith.constant 0 : index
    %c0_1 = arith.constant 0 : index
    %3 = vector.load %arg7[%c0, %c0_1] : memref<8x128xf32, #tpu.memory_space<vmem>>, vector<8x128xf32>
    %c0_2 = arith.constant 0 : index
    %c0_3 = arith.constant 0 : index
    %4 = vector.load %arg2[%c0_2, %c0_3] : memref<8x1024xf32, #tpu.memory_space<vmem>>, vector<8x1024xf32>
    %c0_4 = arith.constant 0 : index
    %c0_5 = arith.constant 0 : index
    %5 = vector.load %arg3[%c0_4, %c0_5] : memref<1024x128xf32, #tpu.memory_space<vmem>>, vector<1024x128xf32>
    %cst = arith.constant dense<0.000000e+00> : vector<8x128xf32>
    %6 = tpu.matmul %4, %5, %cst {dimension_numbers = #tpu.dot_dimension_numbers<[1], [0], [0], [1], [0, 0, 1, 1], [], []>} : vector<8x1024xf32>, vector<1024x128xf32>, vector<8x128xf32> -> vector<8x128xf32>
    %7 = arith.addf %3, %6 : vector<8x128xf32>
    %c0_6 = arith.constant 0 : index
    %c0_7 = arith.constant 0 : index
    %8 = vector.load %arg7[%c0_6, %c0_7] : memref<8x128xf32, #tpu.memory_space<vmem>>, vector<8x128xf32>
    tpu.vector_store %arg7[%c0_6, %c0_7], %7 {strides = array<i32>} : memref<8x128xf32, #tpu.memory_space<vmem>>, vector<8x128xf32>,
    %c0_i32_8 = arith.constant 0 : i32
    %9 = arith.cmpi eq, %arg1, %c0_i32_8 : i32
    %10 = arith.extui %9 : i1 to i32
    %c0_i32_9 = arith.constant 0 : i32
    %11 = arith.cmpi ne, %10, %c0_i32_9 : i32
    scf.if %11 {
      %c0_10 = arith.constant 0 : index
      %c0_11 = arith.constant 0 : index
      %12 = vector.load %arg7[%c0_10, %c0_11] : memref<8x128xf32, #tpu.memory_space<vmem>>, vector<8x128xf32>
      %c0_12 = arith.constant 0 : index
      %c0_13 = arith.constant 0 : index
      %13 = vector.load %arg4[%c0_12, %c0_13] : memref<1x128xf32, #tpu.memory_space<vmem>>, vector<1x128xf32>
      %14 = vector.broadcast %13 : vector<1x128xf32> to vector<8x128xf32>
      %15 = arith.addf %12, %14 : vector<8x128xf32>
      %cst_14 = arith.constant 0.000000e+00 : f32
      %16 = vector.broadcast %cst_14 : f32 to vector<8x128xf32>
      %17 = arith.maximumf %15, %16 : vector<8x128xf32>
      %c0_15 = arith.constant 0 : index
      %c0_16 = arith.constant 0 : index
      %18 = vector.load %arg5[%c0_15, %c0_16] : memref<128x128xf32, #tpu.memory_space<vmem>>, vector<128x128xf32>
      %cst_17 = arith.constant dense<0.000000e+00> : vector<8x128xf32>
      %19 = tpu.matmul %17, %18, %cst_17 {dimension_numbers = #tpu.dot_dimension_numbers<[1], [0], [0], [1], [0, 0, 1, 1], [], []>} : vector<8x128xf32>, vector<128x128xf32>, vector<8x128xf32> -> vector<8x128xf32>
      %c0_18 = arith.constant 0 : index
      %c0_19 = arith.constant 0 : index
      %20 = vector.load %arg6[%c0_18, %c0_19] : memref<1x128xf32, #tpu.memory_space<vmem>>, vector<1x128xf32>
      %21 = vector.broadcast %20 : vector<1x128xf32> to vector<8x128xf32>
      %22 = arith.addf %19, %21 : vector<8x128xf32>
      %cst_20 = arith.constant 0.000000e+00 : f32
      %23 = vector.broadcast %cst_20 : f32 to vector<8x128xf32>
      %24 = arith.maximumf %22, %23 : vector<8x128xf32>
      %c0_21 = arith.constant 0 : index
      %c0_22 = arith.constant 0 : index
      %25 = vector.load %arg7[%c0_21, %c0_22] : memref<8x128xf32, #tpu.memory_space<vmem>>, vector<8x128xf32>
      tpu.vector_store %arg7[%c0_21, %c0_22], %24 {strides = array<i32>} : memref<8x128xf32, #tpu.memory_space<vmem>>, vector<8x128xf32>,
    } else {
    }
    return
  }
  func.func @transform_0(%arg0: i32, %arg1: i32) -> (i32, i32) {
    %c0_i32 = arith.constant 0 : i32
    return %arg0, %arg1 : i32, i32
  }
  func.func @transform_1(%arg0: i32, %arg1: i32) -> (i32, i32) {
    %c0_i32 = arith.constant 0 : i32
    %c0_i32_0 = arith.constant 0 : i32
    return %arg1, %c0_i32 : i32, i32
  }
  func.func @transform_2(%arg0: i32, %arg1: i32) -> (i32, i32) {
    %c0_i32 = arith.constant 0 : i32
    %c0_i32_0 = arith.constant 0 : i32
    %c0_i32_1 = arith.constant 0 : i32
    return %c0_i32, %c0_i32_0 : i32, i32
  }
  func.func @transform_3(%arg0: i32, %arg1: i32) -> (i32, i32) {
    %c0_i32 = arith.constant 0 : i32
    %c0_i32_0 = arith.constant 0 : i32
    %c0_i32_1 = arith.constant 0 : i32
    return %c0_i32, %c0_i32_0 : i32, i32
  }
  func.func @transform_4(%arg0: i32, %arg1: i32) -> (i32, i32) {
    %c0_i32 = arith.constant 0 : i32
    %c0_i32_0 = arith.constant 0 : i32
    %c0_i32_1 = arith.constant 0 : i32
    return %c0_i32, %c0_i32_0 : i32, i32
  }
  func.func @transform_5(%arg0: i32, %arg1: i32) -> (i32, i32) {
    %c0_i32 = arith.constant 0 : i32
    %c0_i32_0 = arith.constant 0 : i32
    return %arg0, %c0_i32 : i32, i32
  }
}

</mosaic_0001>

<bundles_post_ra>
// kernel: tpu_custom_call.1
= control target key start
LH: loop header
LB: loop body
LE: loop exit
PB: predicated region body
PF: predicated region fallthrough
CT: control target
= control target key end

     0   :  { %10 = vsyncpa [#allocation3], 0  ;;  %s952_s0 = inlined_call_operand.hbm [shape: f32[8,1024], index: 0, kind: input, shape index: {}]   ;;  %s953_s1 = inlined_call_operand.hbm [shape: f32[1024,128], index: 1, kind: input, shape index: {}]   ;;  %s954_s2 = inlined_call_operand.vmem [shape: f32[1,128], index: 2, kind: input, shape index: {}]   ;;  %s955_s3 = inlined_call_operand.hbm [shape: f32[128,128], index: 3, kind: input, shape index: {}]   ;;  %s956_s4 = inlined_call_operand.vmem [shape: f32[1,128], index: 4, kind: input, shape index: {}]   ;;  %s957_s5 = inlined_call_operand.hbm [shape: f32[8,128], index: 5, kind: output, shape index: {}]  }
   0x1   :  { %11 = vsyncpa [#allocation6], 0 }
   0x2   :  { %12 = vsyncpa [#allocation4], 0  ;;  %s896_s18 = smov [#allocation5]  }
   0x3   :  { %s28_s19 = sshll.u32 %s896_s18, 4  ;;  %s29_s19 = int_to_ptr.vmem [resolvable:$true] %s28_s19 }
   0x4   :  { %s818_s20 = scalar_lea.vmem %s29_s19, 16384  ;;  %p823_p1 = scmp.lt.s32.totalorder %s29_s19, %s29_s19 }
   0x5   :  { %p819_p0 = scmp.ne.s32.totalorder %s29_s19, %s818_s20  ;;  %p824_p2 = scmp.lt.s32.totalorder %s818_s20, %s818_s20 }
   0x7   :  { %p825_p3 = por %p824_p2, %p823_p1 }
   0x9   :  { %p826_p4 = pnand %p825_p3, %p819_p0 }
   0xb   :  { %829 = shalt.err (!%p826_p4)
}
   0xc   :  { %s897_s21 = smov 128   ;;  %s898_s22 = smov 8  }
   0xd   :  { %34 = dma.hbm_to_vmem [thread:$0]  %s953_s1, 16384, %s29_s19, [#allocation6], %s897_s21, %s897_s21, %s898_s22  }
   0xe   :  { %s899_s25 = smov [#allocation2]   ;;  %s900_s27 = smov [#allocation7]  }
   0xf   :  { %s19_s26 = sshll.u32 %s899_s25, 4  ;;  %s42_s28 = sshll.u32 %s900_s27, 4  ;;  %s20_s26 = int_to_ptr.vmem [resolvable:$true] %s19_s26  ;;  %s43_s28 = int_to_ptr.vmem [resolvable:$true] %s42_s28 }
  0x10   :  { %s838_s29 = scalar_lea.vmem %s20_s26, 1024  ;;  %p843_p6 = scmp.lt.s32.totalorder %s20_s26, %s20_s26 }
  0x11   :  { %p839_p5 = scmp.ne.s32.totalorder %s20_s26, %s838_s29  ;;  %p844_p7 = scmp.lt.s32.totalorder %s838_s29, %s838_s29 }
  0x13   :  { %p845_p8 = por %p844_p7, %p843_p6 }
  0x15   :  { %p846_p9 = pnand %p845_p8, %p839_p5 }
  0x17   :  { %849 = shalt.err (!%p846_p9)
}
  0x18   :  { %22 = dma.hbm_to_vmem [thread:$0]  %s952_s0, 1024, %s20_s26, [#allocation3]  }
  0x19   :  { %s858_s7 = scalar_lea.vmem %s43_s28, 2048  ;;  %p863_p11 = scmp.lt.s32.totalorder %s43_s28, %s43_s28 }
  0x1a   :  { %p859_p10 = scmp.ne.s32.totalorder %s43_s28, %s858_s7  ;;  %p864_p12 = scmp.lt.s32.totalorder %s858_s7, %s858_s7 }
  0x1c   :  { %p865_p13 = por %p864_p12, %p863_p11 }
  0x1e   :  { %p866_p0 = pnand %p865_p13, %p859_p10 }
  0x20   :  { %869 = shalt.err (!%p866_p0)
}
  0x21   :  { %48 = dma.hbm_to_vmem [thread:$0]  %s955_s3, 2048, %s43_s28, [#allocation6], %s897_s21, %s897_s21, %s898_s22  }
  0x22   :  { %890 = dma.done.wait [#allocation3], 1024  }
  0x23   :  { %891 = vsyncadd [#allocation3], 4294966272 }
  0x24   :  { %892 = dma.done.wait [#allocation6], 18432  }
  0x25   :  { %893 = vsyncadd [#allocation6], 4294948864  ;;  %v105_v0 = vld [vmem:[#allocation5 + $0xf8] sm:$0xff]  ;;  %v104_v4 = vld [vmem:[#allocation5 + $0xf0] sm:$0xff]  ;;  %vm902_vm0 = vmmov 0   ;;  %s903_s11 = smov [#allocation8]  }
  0x26   :  { %v137_v1 = vld [vmem:[#allocation5 + $0x1f8] sm:$0xff]  ;;  %610 = vmatprep.subr.mxu0 %v105_v0  ;;  %v136_v5 = vld [vmem:[#allocation5 + $0x1f0] sm:$0xff]  ;;  %v103_v8 = vld [vmem:[#allocation5 + $0xe8] sm:$0xff]  ;;  %s598_s12 = sshll.u32 %s903_s11, 4  ;;  %s599_s12 = int_to_ptr.vmem [resolvable:$true] %s598_s12 }
  0x27   :  { %v89_v2 = vld [vmem:[#allocation5 + $0x78] sm:$0xff]  ;;  %645 = vmatprep.subr.mxu1 %v137_v1  ;;  %v88_v6 = vld [vmem:[#allocation5 + $0x70] sm:$0xff]  ;;  %v135_v9 = vld [vmem:[#allocation5 + $0x1e8] sm:$0xff]  ;;  %s870_s13 = scalar_lea.vmem %s599_s12, 128  ;;  %p875_p2 = scmp.lt.s32.totalorder %s599_s12, %s599_s12 }
  0x28   :  { %v121_v3 = vld [vmem:[#allocation5 + $0x178] sm:$0xff]  ;;  %611 = vmatpush3.msra.mxu0 %v89_v2  ;;  %v120_v7 = vld [vmem:[#allocation5 + $0x170] sm:$0xff]  ;;  %v87_v10 = vld [vmem:[#allocation5 + $0x68] sm:$0xff]  ;;  %p871_p1 = scmp.ne.s32.totalorder %s599_s12, %s870_s13  ;;  %p876_p3 = scmp.lt.s32.totalorder %s870_s13, %s870_s13 }
  0x29   :  { %646 = vmatpush3.msra.mxu1 %v121_v3  ;;  %612 = vmatprep.subr.mxu0 %v104_v4  ;;  %v119_v11 = vld [vmem:[#allocation5 + $0x168] sm:$0xff]  ;;  %v102_v12 = vld [vmem:[#allocation5 + $0xe0] sm:$0xff]  ;;  %v101_v16 = vld [vmem:[#allocation5 + $0xd8] sm:$0xff] }
  0x2a   :  { %647 = vmatprep.subr.mxu1 %v136_v5  ;;  %613 = vmatpush3.msra.mxu0 %v88_v6  ;;  %v134_v13 = vld [vmem:[#allocation5 + $0x1e0] sm:$0xff]  ;;  %v133_v17 = vld [vmem:[#allocation5 + $0x1d8] sm:$0xff]  ;;  %v100_v20 = vld [vmem:[#allocation5 + $0xd0] sm:$0xff]  ;;  %p877_p4 = por %p876_p3, %p875_p2 }
  0x2b   :  { %648 = vmatpush3.msra.mxu1 %v120_v7  ;;  %614 = vmatprep.subr.mxu0 %v103_v8  ;;  %v86_v14 = vld [vmem:[#allocation5 + $0x60] sm:$0xff]  ;;  %v85_v18 = vld [vmem:[#allocation5 + $0x58] sm:$0xff]  ;;  %v132_v21 = vld [vmem:[#allocation5 + $0x1d0] sm:$0xff] }
  0x2c   :  { %649 = vmatprep.subr.mxu1 %v135_v9  ;;  %v118_v15 = vld [vmem:[#allocation5 + $0x160] sm:$0xff]  ;;  %615 = vmatpush3.msra.mxu0 %v87_v10  ;;  %v117_v19 = vld [vmem:[#allocation5 + $0x158] sm:$0xff]  ;;  %v84_v22 = vld [vmem:[#allocation5 + $0x50] sm:$0xff]  ;;  %p878_p5 = pnand %p877_p4, %p871_p1 }
  0x2d   :  { %650 = vmatpush3.msra.mxu1 %v119_v11  ;;  %616 = vmatprep.subr.mxu0 %v102_v12  ;;  %v116_v23 = vld [vmem:[#allocation5 + $0x150] sm:$0xff]  ;;  %v99_v24 = vld [vmem:[#allocation5 + $0xc8] sm:$0xff]  ;;  %v98_v28 = vld [vmem:[#allocation5 + $0xc0] sm:$0xff] }
  0x2e   :  { %651 = vmatprep.subr.mxu1 %v134_v13  ;;  %617 = vmatpush3.msra.mxu0 %v86_v14  ;;  %v131_v25 = vld [vmem:[#allocation5 + $0x1c8] sm:$0xff]  ;;  %v130_v29 = vld [vmem:[#allocation5 + $0x1c0] sm:$0xff]  ;;  %v97_v32 = vld [vmem:[#allocation5 + $0xb8] sm:$0xff] }
  0x2f   :  { %652 = vmatpush3.msra.mxu1 %v118_v15  ;;  %618 = vmatprep.subr.mxu0 %v101_v16  ;;  %v83_v26 = vld [vmem:[#allocation5 + $0x48] sm:$0xff]  ;;  %v82_v30 = vld [vmem:[#allocation5 + $0x40] sm:$0xff]  ;;  %v129_v33 = vld [vmem:[#allocation5 + $0x1b8] sm:$0xff] }
  0x30   :  { %653 = vmatprep.subr.mxu1 %v133_v17  ;;  %619 = vmatpush3.msra.mxu0 %v85_v18  ;;  %v115_v27 = vld [vmem:[#allocation5 + $0x148] sm:$0xff]  ;;  %v114_v31 = vld [vmem:[#allocation5 + $0x140] sm:$0xff]  ;;  %v81_v34 = vld [vmem:[#allocation5 + $0x38] sm:$0xff] }
  0x31   :  { %654 = vmatpush3.msra.mxu1 %v117_v19  ;;  %620 = vmatprep.subr.mxu0 %v100_v20  ;;  %v113_v35 = vld [vmem:[#allocation5 + $0x138] sm:$0xff]  ;;  %v96_v36 = vld [vmem:[#allocation5 + $0xb0] sm:$0xff]  ;;  %v95_v40 = vld [vmem:[#allocation5 + $0xa8] sm:$0xff] }
  0x32   :  { %655 = vmatprep.subr.mxu1 %v132_v21  ;;  %621 = vmatpush3.msra.mxu0 %v84_v22  ;;  %v128_v37 = vld [vmem:[#allocation5 + $0x1b0] sm:$0xff]  ;;  %v127_v41 = vld [vmem:[#allocation5 + $0x1a8] sm:$0xff]  ;;  %v94_v44 = vld [vmem:[#allocation5 + $0xa0] sm:$0xff] }
  0x33   :  { %656 = vmatpush3.msra.mxu1 %v116_v23  ;;  %622 = vmatprep.subr.mxu0 %v99_v24  ;;  %v80_v38 = vld [vmem:[#allocation5 + $0x30] sm:$0xff]  ;;  %v79_v42 = vld [vmem:[#allocation5 + $0x28] sm:$0xff]  ;;  %v126_v45 = vld [vmem:[#allocation5 + $0x1a0] sm:$0xff] }
  0x34   :  { %657 = vmatprep.subr.mxu1 %v131_v25  ;;  %623 = vmatpush3.msra.mxu0 %v83_v26  ;;  %v112_v39 = vld [vmem:[#allocation5 + $0x130] sm:$0xff]  ;;  %v111_v43 = vld [vmem:[#allocation5 + $0x128] sm:$0xff]  ;;  %v78_v46 = vld [vmem:[#allocation5 + $0x20] sm:$0xff] }
  0x35   :  { %658 = vmatpush3.msra.mxu1 %v115_v27  ;;  %624 = vmatprep.subr.mxu0 %v98_v28  ;;  %v110_v47 = vld [vmem:[#allocation5 + $0x120] sm:$0xff]  ;;  %v93_v48 = vld [vmem:[#allocation5 + $0x98] sm:$0xff]  ;;  %v92_v52 = vld [vmem:[#allocation5 + $0x90] sm:$0xff] }
  0x36   :  { %659 = vmatprep.subr.mxu1 %v130_v29  ;;  %625 = vmatpush3.msra.mxu0 %v82_v30  ;;  %v125_v49 = vld [vmem:[#allocation5 + $0x198] sm:$0xff]  ;;  %v124_v53 = vld [vmem:[#allocation5 + $0x190] sm:$0xff]  ;;  %v91_v56 = vld [vmem:[#allocation5 + $0x88] sm:$0xff] }
  0x37   :  { %660 = vmatpush3.msra.mxu1 %v114_v31  ;;  %626 = vmatprep.subr.mxu0 %v97_v32  ;;  %v77_v50 = vld [vmem:[#allocation5 + $0x18] sm:$0xff]  ;;  %v76_v54 = vld [vmem:[#allocation5 + $0x10] sm:$0xff]  ;;  %v123_v57 = vld [vmem:[#allocation5 + $0x188] sm:$0xff] }
  0x38   :  { %661 = vmatprep.subr.mxu1 %v129_v33  ;;  %627 = vmatpush3.msra.mxu0 %v81_v34  ;;  %v109_v51 = vld [vmem:[#allocation5 + $0x118] sm:$0xff]  ;;  %v108_v55 = vld [vmem:[#allocation5 + $0x110] sm:$0xff]  ;;  %v75_v58 = vld [vmem:[#allocation5 + $0x8] sm:$0xff] }
  0x39   :  { %662 = vmatpush3.msra.mxu1 %v113_v35  ;;  %628 = vmatprep.subr.mxu0 %v96_v36  ;;  %v107_v59 = vld [vmem:[#allocation5 + $0x108] sm:$0xff]  ;;  %v90_v60 = vld [vmem:[#allocation5 + $0x80] sm:$0xff]  ;;  %v69_v1 = vld [vmem:[#allocation2 + $0x18] sm:$0xff] }
  0x3a   :  { %663 = vmatprep.subr.mxu1 %v128_v37  ;;  %629 = vmatpush3.msra.mxu0 %v80_v38  ;;  %v122_v61 = vld [vmem:[#allocation5 + $0x180] sm:$0xff]  ;;  %v67_v63 = vld [vmem:[#allocation2 + $0x8] sm:$0xff]  ;;  %v68_v3 = vld [vmem:[#allocation2 + $0x10] sm:$0xff] }
  0x3b   :  { %664 = vmatpush3.msra.mxu1 %v112_v39  ;;  %630 = vmatprep.subr.mxu0 %v95_v40  ;;  %v74_v62 = vld [vmem:[#allocation5] sm:$0xff]  ;;  %v169_v4 = vld [vmem:[#allocation5 + $0x2f8] sm:$0xff]  ;;  %v168_v8 = vld [vmem:[#allocation5 + $0x2f0] sm:$0xff] }
  0x3c   :  { %665 = vmatprep.subr.mxu1 %v127_v41  ;;  %631 = vmatpush3.msra.mxu0 %v79_v42  ;;  %v106_v0 = vld [vmem:[#allocation5 + $0x100] sm:$0xff]  ;;  %v201_v5 = vld [vmem:[#allocation5 + $0x3f8] sm:$0xff]  ;;  %v200_v9 = vld [vmem:[#allocation5 + $0x3f0] sm:$0xff] }
  0x3d   :  { %666 = vmatpush3.msra.mxu1 %v111_v43  ;;  %632 = vmatprep.subr.mxu0 %v94_v44  ;;  %v66_v2 = vld [vmem:[#allocation2] sm:$0xff]  ;;  %v153_v6 = vld [vmem:[#allocation5 + $0x278] sm:$0xff]  ;;  %v152_v10 = vld [vmem:[#allocation5 + $0x270] sm:$0xff] }
  0x3e   :  { %667 = vmatprep.subr.mxu1 %v126_v45  ;;  %633 = vmatpush3.msra.mxu0 %v78_v46  ;;  %v185_v7 = vld [vmem:[#allocation5 + $0x378] sm:$0xff]  ;;  %v184_v11 = vld [vmem:[#allocation5 + $0x370] sm:$0xff]  ;;  %v167_v12 = vld [vmem:[#allocation5 + $0x2e8] sm:$0xff] }
  0x3f   :  { %668 = vmatpush3.msra.mxu1 %v110_v47  ;;  %634 = vmatprep.subr.mxu0 %v93_v48  ;;  %v199_v13 = vld [vmem:[#allocation5 + $0x3e8] sm:$0xff]  ;;  %v166_v16 = vld [vmem:[#allocation5 + $0x2e0] sm:$0xff]  ;;  %v165_v20 = vld [vmem:[#allocation5 + $0x2d8] sm:$0xff] }
  0x40   :  { %669 = vmatprep.subr.mxu1 %v125_v49  ;;  %635 = vmatpush3.msra.mxu0 %v77_v50  ;;  %v151_v14 = vld [vmem:[#allocation5 + $0x268] sm:$0xff]  ;;  %v198_v17 = vld [vmem:[#allocation5 + $0x3e0] sm:$0xff]  ;;  %v197_v21 = vld [vmem:[#allocation5 + $0x3d8] sm:$0xff] }
  0x41   :  { %670 = vmatpush3.msra.mxu1 %v109_v51  ;;  %636 = vmatprep.subr.mxu0 %v92_v52  ;;  %v183_v15 = vld [vmem:[#allocation5 + $0x368] sm:$0xff]  ;;  %v150_v18 = vld [vmem:[#allocation5 + $0x260] sm:$0xff]  ;;  %v149_v22 = vld [vmem:[#allocation5 + $0x258] sm:$0xff] }
  0x42   :  { %671 = vmatprep.subr.mxu1 %v124_v53  ;;  %637 = vmatpush3.msra.mxu0 %v76_v54  ;;  %v182_v19 = vld [vmem:[#allocation5 + $0x360] sm:$0xff]  ;;  %v181_v23 = vld [vmem:[#allocation5 + $0x358] sm:$0xff]  ;;  %v164_v24 = vld [vmem:[#allocation5 + $0x2d0] sm:$0xff] }
  0x43   :  { %672 = vmatpush3.msra.mxu1 %v108_v55  ;;  %638 = vmatprep.subr.mxu0 %v91_v56  ;;  %v196_v25 = vld [vmem:[#allocation5 + $0x3d0] sm:$0xff]  ;;  %v163_v28 = vld [vmem:[#allocation5 + $0x2c8] sm:$0xff]  ;;  %v162_v32 = vld [vmem:[#allocation5 + $0x2c0] sm:$0xff] }
  0x44   :  { %673 = vmatprep.subr.mxu1 %v123_v57  ;;  %639 = vmatpush3.msra.mxu0 %v75_v58  ;;  %v148_v26 = vld [vmem:[#allocation5 + $0x250] sm:$0xff]  ;;  %v195_v29 = vld [vmem:[#allocation5 + $0x3c8] sm:$0xff]  ;;  %v194_v33 = vld [vmem:[#allocation5 + $0x3c0] sm:$0xff] }
  0x45   :  { %674 = vmatpush3.msra.mxu1 %v107_v59  ;;  %640 = vmatprep.subr.mxu0 %v90_v60  ;;  %v180_v27 = vld [vmem:[#allocation5 + $0x350] sm:$0xff]  ;;  %v147_v30 = vld [vmem:[#allocation5 + $0x248] sm:$0xff]  ;;  %v146_v34 = vld [vmem:[#allocation5 + $0x240] sm:$0xff] }
  0x46   :  { %675 = vmatprep.subr.mxu1 %v122_v61  ;;  %641 = vmatpush3.msra.mxu0 %v74_v62  ;;  %v179_v31 = vld [vmem:[#allocation5 + $0x348] sm:$0xff]  ;;  %v178_v35 = vld [vmem:[#allocation5 + $0x340] sm:$0xff]  ;;  %v161_v36 = vld [vmem:[#allocation5 + $0x2b8] sm:$0xff] }
  0x47   :  { %266 = vmatprep.mubr.f32.mxu0 %v67_v63  ;;  %676 = vmatpush3.msra.mxu1 %v106_v0  ;;  %v193_v37 = vld [vmem:[#allocation5 + $0x3b8] sm:$0xff]  ;;  %v160_v40 = vld [vmem:[#allocation5 + $0x2b0] sm:$0xff]  ;;  %v159_v44 = vld [vmem:[#allocation5 + $0x2a8] sm:$0xff] }
  0x48   :  { %336 = vmatprep.mubr.f32.mxu1 %v69_v1  ;;  %267 = vmatmul.mubr.f32.vlgmr.msra.gmra.mxu0 %v66_v2  ;;  %v145_v38 = vld [vmem:[#allocation5 + $0x238] sm:$0xff]  ;;  %v192_v41 = vld [vmem:[#allocation5 + $0x3b0] sm:$0xff]  ;;  %v191_v45 = vld [vmem:[#allocation5 + $0x3a8] sm:$0xff] }
  0x49   :  { %337 = vmatmul.mubr.f32.vlgmr.msra.gmra.mxu1 %v68_v3  ;;  %680 = vmatprep.subr.mxu0 %v169_v4  ;;  %v177_v39 = vld [vmem:[#allocation5 + $0x338] sm:$0xff]  ;;  %v144_v42 = vld [vmem:[#allocation5 + $0x230] sm:$0xff]  ;;  %v143_v46 = vld [vmem:[#allocation5 + $0x228] sm:$0xff] }
  0x4a   :  { %715 = vmatprep.subr.mxu1 %v201_v5  ;;  %681 = vmatpush3.msra.mxu0 %v153_v6  ;;  %v176_v43 = vld [vmem:[#allocation5 + $0x330] sm:$0xff]  ;;  %v175_v47 = vld [vmem:[#allocation5 + $0x328] sm:$0xff]  ;;  %v158_v48 = vld [vmem:[#allocation5 + $0x2a0] sm:$0xff] }
  0x4b   :  { %716 = vmatpush3.msra.mxu1 %v185_v7  ;;  %682 = vmatprep.subr.mxu0 %v168_v8  ;;  %v190_v49 = vld [vmem:[#allocation5 + $0x3a0] sm:$0xff]  ;;  %v157_v52 = vld [vmem:[#allocation5 + $0x298] sm:$0xff]  ;;  %v156_v56 = vld [vmem:[#allocation5 + $0x290] sm:$0xff] }
  0x4c   :  { %717 = vmatprep.subr.mxu1 %v200_v9  ;;  %683 = vmatpush3.msra.mxu0 %v152_v10  ;;  %v142_v50 = vld [vmem:[#allocation5 + $0x220] sm:$0xff]  ;;  %v189_v53 = vld [vmem:[#allocation5 + $0x398] sm:$0xff]  ;;  %v188_v57 = vld [vmem:[#allocation5 + $0x390] sm:$0xff]  ;;  %v901_v9 = vmov 0.0  }
  0x4d   :  { %718 = vmatpush3.msra.mxu1 %v184_v11  ;;  %684 = vmatprep.subr.mxu0 %v167_v12  ;;  %v174_v51 = vld [vmem:[#allocation5 + $0x320] sm:$0xff]  ;;  %v141_v54 = vld [vmem:[#allocation5 + $0x218] sm:$0xff]  ;;  %v140_v58 = vld [vmem:[#allocation5 + $0x210] sm:$0xff] }
  0x4e   :  { %719 = vmatprep.subr.mxu1 %v199_v13  ;;  %685 = vmatpush3.msra.mxu0 %v151_v14  ;;  %v173_v55 = vld [vmem:[#allocation5 + $0x318] sm:$0xff]  ;;  %v172_v59 = vld [vmem:[#allocation5 + $0x310] sm:$0xff]  ;;  %v155_v60 = vld [vmem:[#allocation5 + $0x288] sm:$0xff] }
  0x4f   :  { %720 = vmatpush3.msra.mxu1 %v183_v15  ;;  %686 = vmatprep.subr.mxu0 %v166_v16  ;;  %v187_v61 = vld [vmem:[#allocation5 + $0x388] sm:$0xff]  ;;  %v154_v0 = vld [vmem:[#allocation5 + $0x280] sm:$0xff]  ;;  %v73_v5 = vld [vmem:[#allocation2 + $0x38] sm:$0xff] }
  0x50   :  { %721 = vmatprep.subr.mxu1 %v198_v17  ;;  %687 = vmatpush3.msra.mxu0 %v150_v18  ;;  %v139_v62 = vld [vmem:[#allocation5 + $0x208] sm:$0xff]  ;;  %v186_v1 = vld [vmem:[#allocation5 + $0x380] sm:$0xff]  ;;  %v72_v7 = vld [vmem:[#allocation2 + $0x30] sm:$0xff] }
  0x51   :  { %722 = vmatpush3.msra.mxu1 %v182_v19  ;;  %688 = vmatprep.subr.mxu0 %v165_v20  ;;  %v171_v63 = vld [vmem:[#allocation5 + $0x308] sm:$0xff]  ;;  %v138_v2 = vld [vmem:[#allocation5 + $0x200] sm:$0xff]  ;;  %v512_v8 = vld [vmem:[#allocation7 + $0x78] sm:$0xff] }
  0x52   :  { %723 = vmatprep.subr.mxu1 %v197_v21  ;;  %689 = vmatpush3.msra.mxu0 %v149_v22  ;;  %v71_v3 = vld [vmem:[#allocation2 + $0x28] sm:$0xff]  ;;  %v170_v4 = vld [vmem:[#allocation5 + $0x300] sm:$0xff]  ;;  %v511_v10 = vld [vmem:[#allocation7 + $0x70] sm:$0xff] }
  0x53   :  { %724 = vmatpush3.msra.mxu1 %v181_v23  ;;  %690 = vmatprep.subr.mxu0 %v164_v24  ;;  %v70_v6 = vld [vmem:[#allocation2 + $0x20] sm:$0xff]  ;;  %v510_v11 = vld [vmem:[#allocation7 + $0x68] sm:$0xff]  ;;  %v508_v13 = vld [vmem:[#allocation7 + $0x58] sm:$0xff] }
  0x54   :  { %725 = vmatprep.subr.mxu1 %v196_v25  ;;  %691 = vmatpush3.msra.mxu0 %v148_v26  ;;  %v509_v12 = vld [vmem:[#allocation7 + $0x60] sm:$0xff]  ;;  %v507_v14 = vld [vmem:[#allocation7 + $0x50] sm:$0xff]  ;;  %v506_v15 = vld [vmem:[#allocation7 + $0x48] sm:$0xff] }
  0x55   :  { %726 = vmatpush3.msra.mxu1 %v180_v27  ;;  %692 = vmatprep.subr.mxu0 %v163_v28  ;;  %v505_v16 = vld [vmem:[#allocation7 + $0x40] sm:$0xff]  ;;  %v504_v17 = vld [vmem:[#allocation7 + $0x38] sm:$0xff]  ;;  %v503_v18 = vld [vmem:[#allocation7 + $0x30] sm:$0xff] }
  0x56   :  { %727 = vmatprep.subr.mxu1 %v195_v29  ;;  %693 = vmatpush3.msra.mxu0 %v147_v30  ;;  %v502_v19 = vld [vmem:[#allocation7 + $0x28] sm:$0xff]  ;;  %v501_v20 = vld [vmem:[#allocation7 + $0x20] sm:$0xff]  ;;  %v500_v21 = vld [vmem:[#allocation7 + $0x18] sm:$0xff] }
  0x57   :  { %728 = vmatpush3.msra.mxu1 %v179_v31  ;;  %694 = vmatprep.subr.mxu0 %v162_v32  ;;  %v499_v22 = vld [vmem:[#allocation7 + $0x10] sm:$0xff]  ;;  %v498_v23 = vld [vmem:[#allocation7 + $0x8] sm:$0xff]  ;;  %v497_v24 = vld [vmem:[#allocation7] sm:$0xff] }
  0x58   :  { %729 = vmatprep.subr.mxu1 %v194_v33  ;;  %695 = vmatpush3.msra.mxu0 %v146_v34 }
  0x59   :  { %730 = vmatpush3.msra.mxu1 %v178_v35  ;;  %696 = vmatprep.subr.mxu0 %v161_v36 }
  0x5a   :  { %731 = vmatprep.subr.mxu1 %v193_v37  ;;  %697 = vmatpush3.msra.mxu0 %v145_v38 }
  0x5b   :  { %732 = vmatpush3.msra.mxu1 %v177_v39  ;;  %698 = vmatprep.subr.mxu0 %v160_v40  ;;  %v608_v40 = vld [vmem:[%s954_s2] ss:$0 sm:$0xff] }
  0x5c   :  { %733 = vmatprep.subr.mxu1 %v192_v41  ;;  %699 = vmatpush3.msra.mxu0 %v144_v42 }
  0x5d   :  { %734 = vmatpush3.msra.mxu1 %v176_v43  ;;  %700 = vmatprep.subr.mxu0 %v159_v44  ;;  %v609_v43 = vld [vmem:[%s956_s4] ss:$0 sm:$0xff] }
  0x5e   :  { %735 = vmatprep.subr.mxu1 %v191_v45  ;;  %701 = vmatpush3.msra.mxu0 %v143_v46 }
  0x5f   :  { %736 = vmatpush3.msra.mxu1 %v175_v47  ;;  %702 = vmatprep.subr.mxu0 %v158_v48 }
  0x60   :  { %737 = vmatprep.subr.mxu1 %v190_v49  ;;  %703 = vmatpush3.msra.mxu0 %v142_v50 }
  0x61   :  { %738 = vmatpush3.msra.mxu1 %v174_v51  ;;  %704 = vmatprep.subr.mxu0 %v157_v52 }
  0x62   :  { %739 = vmatprep.subr.mxu1 %v189_v53  ;;  %705 = vmatpush3.msra.mxu0 %v141_v54 }
  0x63   :  { %740 = vmatpush3.msra.mxu1 %v173_v55  ;;  %706 = vmatprep.subr.mxu0 %v156_v56 }
  0x64   :  { %741 = vmatprep.subr.mxu1 %v188_v57  ;;  %707 = vmatpush3.msra.mxu0 %v140_v58 }
  0x65   :  { %742 = vmatpush3.msra.mxu1 %v172_v59  ;;  %708 = vmatprep.subr.mxu0 %v155_v60 }
  0x66   :  { %743 = vmatprep.subr.mxu1 %v187_v61  ;;  %709 = vmatpush3.msra.mxu0 %v139_v62 }
  0x67   :  { %744 = vmatpush3.msra.mxu1 %v171_v63  ;;  %710 = vmatprep.subr.mxu0 %v154_v0 }
  0x68   :  { %745 = vmatprep.subr.mxu1 %v186_v1  ;;  %711 = vmatpush3.msra.mxu0 %v138_v2 }
  0x69   :  { %406 = vmatprep.mubr.f32.mxu0 %v71_v3  ;;  %746 = vmatpush3.msra.mxu1 %v170_v4 }
  0x6a   :  { %476 = vmatprep.mubr.f32.mxu1 %v73_v5  ;;  %407 = vmatmul.mubr.f32.vlgmr.msra.gmra.mxu0 %v70_v6 }
  0x6b   :  { %477 = vmatmul.mubr.f32.vlgmr.msra.gmra.mxu1 %v72_v7  ;;  %767 = vmatprep.subr.mxu0 %v901_v9 }
  0x6c   :  { %768 = vmatpush3.msra.mxu0 %v512_v8  ;;  %799 = vmatprep.mubr.msk.f32.mxu0 %vm902_vm0, %v901_v9 }
  0x6d   :  { %769 = vmatprep.subr.mxu0 %v901_v9 }
  0x6e   :  { %770 = vmatpush3.msra.mxu0 %v511_v10 }
  0x6f   :  { %771 = vmatprep.subr.mxu0 %v901_v9 }
  0x70   :  { %772 = vmatpush3.msra.mxu0 %v510_v11 }
  0x71   :  { %773 = vmatprep.subr.mxu0 %v901_v9 }
  0x72   :  { %774 = vmatpush3.msra.mxu0 %v509_v12 }
  0x73   :  { %775 = vmatprep.subr.mxu0 %v901_v9 }
  0x74   :  { %776 = vmatpush3.msra.mxu0 %v508_v13 }
  0x75   :  { %777 = vmatprep.subr.mxu0 %v901_v9 }
  0x76   :  { %778 = vmatpush3.msra.mxu0 %v507_v14 }
  0x77   :  { %779 = vmatprep.subr.mxu0 %v901_v9 }
  0x78   :  { %780 = vmatpush3.msra.mxu0 %v506_v15 }
  0x79   :  { %781 = vmatprep.subr.mxu0 %v901_v9 }
  0x7a   :  { %782 = vmatpush3.msra.mxu0 %v505_v16 }
  0x7b   :  { %783 = vmatprep.subr.mxu0 %v901_v9 }
  0x7c   :  { %784 = vmatpush3.msra.mxu0 %v504_v17 }
  0x7d   :  { %785 = vmatprep.subr.mxu0 %v901_v9 }
  0x7e   :  { %786 = vmatpush3.msra.mxu0 %v503_v18 }
  0x7f   :  { %787 = vmatprep.subr.mxu0 %v901_v9 }
  0x80   :  { %788 = vmatpush3.msra.mxu0 %v502_v19 }
  0x81   :  { %789 = vmatprep.subr.mxu0 %v901_v9 }
  0x82   :  { %790 = vmatpush3.msra.mxu0 %v501_v20 }
  0x83   :  { %791 = vmatprep.subr.mxu0 %v901_v9 }
  0x84   :  { %792 = vmatpush3.msra.mxu0 %v500_v21 }
  0x85   :  { %793 = vmatprep.subr.mxu0 %v901_v9 }
  0x86   :  { %794 = vmatpush3.msra.mxu0 %v499_v22 }
  0x87   :  { %795 = vmatprep.subr.mxu0 %v901_v9 }
  0x88   :  { %796 = vmatpush3.msra.mxu0 %v498_v23 }
  0x89   :  { %797 = vmatprep.subr.mxu0 %v901_v9 }
  0x8a   :  { %798 = vmatpush3.msra.mxu0 %v497_v24 }
 0x108   :  { %v642_v25 = vpop.f32.mrf.mxu0 }
 0x109   :  { %v677_v26 = vpop.f32.mrf.mxu1 }
 0x10a   :  { %v643_v27 = vpop.f32.mrf.mxu0 }
 0x10b   :  { %v678_v28 = vpop.f32.mrf.mxu1  ;;  %v644_v29 = vadd.f32 %v643_v27, %v642_v25 }
 0x10c   :  { %v679_v30 = vadd.f32 %v678_v28, %v677_v26 }
 0x10e   :  { %v339_v35 = vadd.f32 %v679_v30, %v644_v29 }
 0x12a   :  { %v712_v31 = vpop.f32.mrf.mxu0 }
 0x12b   :  { %v747_v32 = vpop.f32.mrf.mxu1 }
 0x12c   :  { %v713_v33 = vpop.f32.mrf.mxu0 }
 0x12d   :  { %v748_v34 = vpop.f32.mrf.mxu1  ;;  %v714_v36 = vadd.f32 %v713_v33, %v712_v31 }
 0x12e   :  { %v749_v38 = vadd.f32 %v748_v34, %v747_v32 }
 0x12f   :  { %v409_v37 = vadd.f32 %v714_v36, %v339_v35 }
 0x131   :  { %v479_v39 = vadd.f32 %v749_v38, %v409_v37 }
 0x133   :  { %v495_v41 = vadd.f32 %v608_v40, %v479_v39 }
 0x135   :  { %v496_v42 = vmax.f32 %v495_v41, 0.0 }
 0x137   :  { %800 = vmatmul.mubr.f32.vlgmr.msra.gmra.mxu0 %v496_v42 }
 0x1f7   :  { %v586_v44 = vpop.f32.mrf.mxu0 }
 0x1f8   :  { %v587_v45 = vadd.f32 %v609_v43, %v586_v44 }
 0x1f9   :  { %v801_v46 = vpop.f32.mrf.mxu0 }
 0x1fa   :  { %v590_v47 = vmax.f32 %v587_v45, 0.0 }
 0x1fc   :  { %591 = vst [vmem:[#allocation8] sm:$0xff] %v590_v47 }
 0x1fd   :  { %881 = shalt.err (!%p878_p5)
}
 0x1fe   :  { %601 = dma.vmem_to_hbm [thread:$0]  %s599_s12, 128, %s957_s5, [#allocation4]  }
 0x1ff   :  { %894 = dma.done.wait [#allocation4], 128  }
 0x200   :  { %895 = vsyncadd [#allocation4], 4294967168 }
 0x201   :  { %605 = vsyncpa [#allocation3], 1 }
 0x202   :  { %606 = vsyncpa [#allocation6], 1 }
 0x203   :  { %607 = vsyncpa [#allocation4], 1 }

// kernel: tpu_custom_call.1
= control target key start
LH: loop header
LB: loop body
LE: loop exit
PB: predicated region body
PF: predicated region fallthrough
CT: control target
= control target key end

     0   :  { %10 = vsyncpa [#allocation3], 0  ;;  %s952_s0 = inlined_call_operand.hbm [shape: f32[8,1024], index: 0, kind: input, shape index: {}]   ;;  %s953_s1 = inlined_call_operand.hbm [shape: f32[1024,128], index: 1, kind: input, shape index: {}]   ;;  %s954_s2 = inlined_call_operand.vmem [shape: f32[1,128], index: 2, kind: input, shape index: {}]   ;;  %s955_s3 = inlined_call_operand.hbm [shape: f32[128,128], index: 3, kind: input, shape index: {}]   ;;  %s956_s4 = inlined_call_operand.vmem [shape: f32[1,128], index: 4, kind: input, shape index: {}]   ;;  %s957_s5 = inlined_call_operand.hbm [shape: f32[8,128], index: 5, kind: output, shape index: {}]  }
   0x1   :  { %11 = vsyncpa [#allocation6], 0 }
   0x2   :  { %12 = vsyncpa [#allocation4], 0  ;;  %s896_s18 = smov [#allocation5]  }
   0x3   :  { %s28_s19 = sshll.u32 %s896_s18, 4  ;;  %s29_s19 = int_to_ptr.vmem [resolvable:$true] %s28_s19 }
   0x4   :  { %s818_s20 = scalar_lea.vmem %s29_s19, 16384  ;;  %p823_p1 = scmp.lt.s32.totalorder %s29_s19, %s29_s19 }
   0x5   :  { %p819_p0 = scmp.ne.s32.totalorder %s29_s19, %s818_s20  ;;  %p824_p2 = scmp.lt.s32.totalorder %s818_s20, %s818_s20 }
   0x7   :  { %p825_p3 = por %p824_p2, %p823_p1 }
   0x9   :  { %p826_p4 = pnand %p825_p3, %p819_p0 }
   0xb   :  { %829 = shalt.err (!%p826_p4)
}
   0xc   :  { %s897_s21 = smov 128   ;;  %s898_s22 = smov 8  }
   0xd   :  { %34 = dma.hbm_to_vmem [thread:$0]  %s953_s1, 16384, %s29_s19, [#allocation6], %s897_s21, %s897_s21, %s898_s22  }
   0xe   :  { %s899_s25 = smov [#allocation2]   ;;  %s900_s27 = smov [#allocation7]  }
   0xf   :  { %s19_s26 = sshll.u32 %s899_s25, 4  ;;  %s42_s28 = sshll.u32 %s900_s27, 4  ;;  %s20_s26 = int_to_ptr.vmem [resolvable:$true] %s19_s26  ;;  %s43_s28 = int_to_ptr.vmem [resolvable:$true] %s42_s28 }
  0x10   :  { %s838_s29 = scalar_lea.vmem %s20_s26, 1024  ;;  %p843_p6 = scmp.lt.s32.totalorder %s20_s26, %s20_s26 }
  0x11   :  { %p839_p5 = scmp.ne.s32.totalorder %s20_s26, %s838_s29  ;;  %p844_p7 = scmp.lt.s32.totalorder %s838_s29, %s838_s29 }
  0x13   :  { %p845_p8 = por %p844_p7, %p843_p6 }
  0x15   :  { %p846_p9 = pnand %p845_p8, %p839_p5 }
  0x17   :  { %849 = shalt.err (!%p846_p9)
}
  0x18   :  { %22 = dma.hbm_to_vmem [thread:$0]  %s952_s0, 1024, %s20_s26, [#allocation3]  }
  0x19   :  { %s858_s7 = scalar_lea.vmem %s43_s28, 2048  ;;  %p863_p11 = scmp.lt.s32.totalorder %s43_s28, %s43_s28 }
  0x1a   :  { %p859_p10 = scmp.ne.s32.totalorder %s43_s28, %s858_s7  ;;  %p864_p12 = scmp.lt.s32.totalorder %s858_s7, %s858_s7 }
  0x1c   :  { %p865_p13 = por %p864_p12, %p863_p11 }
  0x1e   :  { %p866_p0 = pnand %p865_p13, %p859_p10 }
  0x20   :  { %869 = shalt.err (!%p866_p0)
}
  0x21   :  { %48 = dma.hbm_to_vmem [thread:$0]  %s955_s3, 2048, %s43_s28, [#allocation6], %s897_s21, %s897_s21, %s898_s22  }
  0x22   :  { %890 = dma.done.wait [#allocation3], 1024  }
  0x23   :  { %891 = vsyncadd [#allocation3], 4294966272 }
  0x24   :  { %892 = dma.done.wait [#allocation6], 18432  }
  0x25   :  { %893 = vsyncadd [#allocation6], 4294948864  ;;  %v105_v0 = vld [vmem:[#allocation5 + $0xf8] sm:$0xff]  ;;  %v104_v4 = vld [vmem:[#allocation5 + $0xf0] sm:$0xff]  ;;  %vm902_vm0 = vmmov 0   ;;  %s903_s11 = smov [#allocation8]  }
  0x26   :  { %v137_v1 = vld [vmem:[#allocation5 + $0x1f8] sm:$0xff]  ;;  %610 = vmatprep.subr.mxu0 %v105_v0  ;;  %v136_v5 = vld [vmem:[#allocation5 + $0x1f0] sm:$0xff]  ;;  %v103_v8 = vld [vmem:[#allocation5 + $0xe8] sm:$0xff]  ;;  %s598_s12 = sshll.u32 %s903_s11, 4  ;;  %s599_s12 = int_to_ptr.vmem [resolvable:$true] %s598_s12 }
  0x27   :  { %v89_v2 = vld [vmem:[#allocation5 + $0x78] sm:$0xff]  ;;  %645 = vmatprep.subr.mxu1 %v137_v1  ;;  %v88_v6 = vld [vmem:[#allocation5 + $0x70] sm:$0xff]  ;;  %v135_v9 = vld [vmem:[#allocation5 + $0x1e8] sm:$0xff]  ;;  %s870_s13 = scalar_lea.vmem %s599_s12, 128  ;;  %p875_p2 = scmp.lt.s32.totalorder %s599_s12, %s599_s12 }
  0x28   :  { %v121_v3 = vld [vmem:[#allocation5 + $0x178] sm:$0xff]  ;;  %611 = vmatpush3.msra.mxu0 %v89_v2  ;;  %v120_v7 = vld [vmem:[#allocation5 + $0x170] sm:$0xff]  ;;  %v87_v10 = vld [vmem:[#allocation5 + $0x68] sm:$0xff]  ;;  %p871_p1 = scmp.ne.s32.totalorder %s599_s12, %s870_s13  ;;  %p876_p3 = scmp.lt.s32.totalorder %s870_s13, %s870_s13 }
  0x29   :  { %646 = vmatpush3.msra.mxu1 %v121_v3  ;;  %612 = vmatprep.subr.mxu0 %v104_v4  ;;  %v119_v11 = vld [vmem:[#allocation5 + $0x168] sm:$0xff]  ;;  %v102_v12 = vld [vmem:[#allocation5 + $0xe0] sm:$0xff]  ;;  %v101_v16 = vld [vmem:[#allocation5 + $0xd8] sm:$0xff] }
  0x2a   :  { %647 = vmatprep.subr.mxu1 %v136_v5  ;;  %613 = vmatpush3.msra.mxu0 %v88_v6  ;;  %v134_v13 = vld [vmem:[#allocation5 + $0x1e0] sm:$0xff]  ;;  %v133_v17 = vld [vmem:[#allocation5 + $0x1d8] sm:$0xff]  ;;  %v100_v20 = vld [vmem:[#allocation5 + $0xd0] sm:$0xff]  ;;  %p877_p4 = por %p876_p3, %p875_p2 }
  0x2b   :  { %648 = vmatpush3.msra.mxu1 %v120_v7  ;;  %614 = vmatprep.subr.mxu0 %v103_v8  ;;  %v86_v14 = vld [vmem:[#allocation5 + $0x60] sm:$0xff]  ;;  %v85_v18 = vld [vmem:[#allocation5 + $0x58] sm:$0xff]  ;;  %v132_v21 = vld [vmem:[#allocation5 + $0x1d0] sm:$0xff] }
  0x2c   :  { %649 = vmatprep.subr.mxu1 %v135_v9  ;;  %v118_v15 = vld [vmem:[#allocation5 + $0x160] sm:$0xff]  ;;  %615 = vmatpush3.msra.mxu0 %v87_v10  ;;  %v117_v19 = vld [vmem:[#allocation5 + $0x158] sm:$0xff]  ;;  %v84_v22 = vld [vmem:[#allocation5 + $0x50] sm:$0xff]  ;;  %p878_p5 = pnand %p877_p4, %p871_p1 }
  0x2d   :  { %650 = vmatpush3.msra.mxu1 %v119_v11  ;;  %616 = vmatprep.subr.mxu0 %v102_v12  ;;  %v116_v23 = vld [vmem:[#allocation5 + $0x150] sm:$0xff]  ;;  %v99_v24 = vld [vmem:[#allocation5 + $0xc8] sm:$0xff]  ;;  %v98_v28 = vld [vmem:[#allocation5 + $0xc0] sm:$0xff] }
  0x2e   :  { %651 = vmatprep.subr.mxu1 %v134_v13  ;;  %617 = vmatpush3.msra.mxu0 %v86_v14  ;;  %v131_v25 = vld [vmem:[#allocation5 + $0x1c8] sm:$0xff]  ;;  %v130_v29 = vld [vmem:[#allocation5 + $0x1c0] sm:$0xff]  ;;  %v97_v32 = vld [vmem:[#allocation5 + $0xb8] sm:$0xff] }
  0x2f   :  { %652 = vmatpush3.msra.mxu1 %v118_v15  ;;  %618 = vmatprep.subr.mxu0 %v101_v16  ;;  %v83_v26 = vld [vmem:[#allocation5 + $0x48] sm:$0xff]  ;;  %v82_v30 = vld [vmem:[#allocation5 + $0x40] sm:$0xff]  ;;  %v129_v33 = vld [vmem:[#allocation5 + $0x1b8] sm:$0xff] }
  0x30   :  { %653 = vmatprep.subr.mxu1 %v133_v17  ;;  %619 = vmatpush3.msra.mxu0 %v85_v18  ;;  %v115_v27 = vld [vmem:[#allocation5 + $0x148] sm:$0xff]  ;;  %v114_v31 = vld [vmem:[#allocation5 + $0x140] sm:$0xff]  ;;  %v81_v34 = vld [vmem:[#allocation5 + $0x38] sm:$0xff] }
  0x31   :  { %654 = vmatpush3.msra.mxu1 %v117_v19  ;;  %620 = vmatprep.subr.mxu0 %v100_v20  ;;  %v113_v35 = vld [vmem:[#allocation5 + $0x138] sm:$0xff]  ;;  %v96_v36 = vld [vmem:[#allocation5 + $0xb0] sm:$0xff]  ;;  %v95_v40 = vld [vmem:[#allocation5 + $0xa8] sm:$0xff] }
  0x32   :  { %655 = vmatprep.subr.mxu1 %v132_v21  ;;  %621 = vmatpush3.msra.mxu0 %v84_v22  ;;  %v128_v37 = vld [vmem:[#allocation5 + $0x1b0] sm:$0xff]  ;;  %v127_v41 = vld [vmem:[#allocation5 + $0x1a8] sm:$0xff]  ;;  %v94_v44 = vld [vmem:[#allocation5 + $0xa0] sm:$0xff] }
  0x33   :  { %656 = vmatpush3.msra.mxu1 %v116_v23  ;;  %622 = vmatprep.subr.mxu0 %v99_v24  ;;  %v80_v38 = vld [vmem:[#allocation5 + $0x30] sm:$0xff]  ;;  %v79_v42 = vld [vmem:[#allocation5 + $0x28] sm:$0xff]  ;;  %v126_v45 = vld [vmem:[#allocation5 + $0x1a0] sm:$0xff] }
  0x34   :  { %657 = vmatprep.subr.mxu1 %v131_v25  ;;  %623 = vmatpush3.msra.mxu0 %v83_v26  ;;  %v112_v39 = vld [vmem:[#allocation5 + $0x130] sm:$0xff]  ;;  %v111_v43 = vld [vmem:[#allocation5 + $0x128] sm:$0xff]  ;;  %v78_v46 = vld [vmem:[#allocation5 + $0x20] sm:$0xff] }
  0x35   :  { %658 = vmatpush3.msra.mxu1 %v115_v27  ;;  %624 = vmatprep.subr.mxu0 %v98_v28  ;;  %v110_v47 = vld [vmem:[#allocation5 + $0x120] sm:$0xff]  ;;  %v93_v48 = vld [vmem:[#allocation5 + $0x98] sm:$0xff]  ;;  %v92_v52 = vld [vmem:[#allocation5 + $0x90] sm:$0xff] }
  0x36   :  { %659 = vmatprep.subr.mxu1 %v130_v29  ;;  %625 = vmatpush3.msra.mxu0 %v82_v30  ;;  %v125_v49 = vld [vmem:[#allocation5 + $0x198] sm:$0xff]  ;;  %v124_v53 = vld [vmem:[#allocation5 + $0x190] sm:$0xff]  ;;  %v91_v56 = vld [vmem:[#allocation5 + $0x88] sm:$0xff] }
  0x37   :  { %660 = vmatpush3.msra.mxu1 %v114_v31  ;;  %626 = vmatprep.subr.mxu0 %v97_v32  ;;  %v77_v50 = vld [vmem:[#allocation5 + $0x18] sm:$0xff]  ;;  %v76_v54 = vld [vmem:[#allocation5 + $0x10] sm:$0xff]  ;;  %v123_v57 = vld [vmem:[#allocation5 + $0x188] sm:$0xff] }
  0x38   :  { %661 = vmatprep.subr.mxu1 %v129_v33  ;;  %627 = vmatpush3.msra.mxu0 %v81_v34  ;;  %v109_v51 = vld [vmem:[#allocation5 + $0x118] sm:$0xff]  ;;  %v108_v55 = vld [vmem:[#allocation5 + $0x110] sm:$0xff]  ;;  %v75_v58 = vld [vmem:[#allocation5 + $0x8] sm:$0xff] }
  0x39   :  { %662 = vmatpush3.msra.mxu1 %v113_v35  ;;  %628 = vmatprep.subr.mxu0 %v96_v36  ;;  %v107_v59 = vld [vmem:[#allocation5 + $0x108] sm:$0xff]  ;;  %v90_v60 = vld [vmem:[#allocation5 + $0x80] sm:$0xff]  ;;  %v69_v1 = vld [vmem:[#allocation2 + $0x18] sm:$0xff] }
  0x3a   :  { %663 = vmatprep.subr.mxu1 %v128_v37  ;;  %629 = vmatpush3.msra.mxu0 %v80_v38  ;;  %v122_v61 = vld [vmem:[#allocation5 + $0x180] sm:$0xff]  ;;  %v67_v63 = vld [vmem:[#allocation2 + $0x8] sm:$0xff]  ;;  %v68_v3 = vld [vmem:[#allocation2 + $0x10] sm:$0xff] }
  0x3b   :  { %664 = vmatpush3.msra.mxu1 %v112_v39  ;;  %630 = vmatprep.subr.mxu0 %v95_v40  ;;  %v74_v62 = vld [vmem:[#allocation5] sm:$0xff]  ;;  %v169_v4 = vld [vmem:[#allocation5 + $0x2f8] sm:$0xff]  ;;  %v168_v8 = vld [vmem:[#allocation5 + $0x2f0] sm:$0xff] }
  0x3c   :  { %665 = vmatprep.subr.mxu1 %v127_v41  ;;  %631 = vmatpush3.msra.mxu0 %v79_v42  ;;  %v106_v0 = vld [vmem:[#allocation5 + $0x100] sm:$0xff]  ;;  %v201_v5 = vld [vmem:[#allocation5 + $0x3f8] sm:$0xff]  ;;  %v200_v9 = vld [vmem:[#allocation5 + $0x3f0] sm:$0xff] }
  0x3d   :  { %666 = vmatpush3.msra.mxu1 %v111_v43  ;;  %632 = vmatprep.subr.mxu0 %v94_v44  ;;  %v66_v2 = vld [vmem:[#allocation2] sm:$0xff]  ;;  %v153_v6 = vld [vmem:[#allocation5 + $0x278] sm:$0xff]  ;;  %v152_v10 = vld [vmem:[#allocation5 + $0x270] sm:$0xff] }
  0x3e   :  { %667 = vmatprep.subr.mxu1 %v126_v45  ;;  %633 = vmatpush3.msra.mxu0 %v78_v46  ;;  %v185_v7 = vld [vmem:[#allocation5 + $0x378] sm:$0xff]  ;;  %v184_v11 = vld [vmem:[#allocation5 + $0x370] sm:$0xff]  ;;  %v167_v12 = vld [vmem:[#allocation5 + $0x2e8] sm:$0xff] }
  0x3f   :  { %668 = vmatpush3.msra.mxu1 %v110_v47  ;;  %634 = vmatprep.subr.mxu0 %v93_v48  ;;  %v199_v13 = vld [vmem:[#allocation5 + $0x3e8] sm:$0xff]  ;;  %v166_v16 = vld [vmem:[#allocation5 + $0x2e0] sm:$0xff]  ;;  %v165_v20 = vld [vmem:[#allocation5 + $0x2d8] sm:$0xff] }
  0x40   :  { %669 = vmatprep.subr.mxu1 %v125_v49  ;;  %635 = vmatpush3.msra.mxu0 %v77_v50  ;;  %v151_v14 = vld [vmem:[#allocation5 + $0x268] sm:$0xff]  ;;  %v198_v17 = vld [vmem:[#allocation5 + $0x3e0] sm:$0xff]  ;;  %v197_v21 = vld [vmem:[#allocation5 + $0x3d8] sm:$0xff] }
  0x41   :  { %670 = vmatpush3.msra.mxu1 %v109_v51  ;;  %636 = vmatprep.subr.mxu0 %v92_v52  ;;  %v183_v15 = vld [vmem:[#allocation5 + $0x368] sm:$0xff]  ;;  %v150_v18 = vld [vmem:[#allocation5 + $0x260] sm:$0xff]  ;;  %v149_v22 = vld [vmem:[#allocation5 + $0x258] sm:$0xff] }
  0x42   :  { %671 = vmatprep.subr.mxu1 %v124_v53  ;;  %637 = vmatpush3.msra.mxu0 %v76_v54  ;;  %v182_v19 = vld [vmem:[#allocation5 + $0x360] sm:$0xff]  ;;  %v181_v23 = vld [vmem:[#allocation5 + $0x358] sm:$0xff]  ;;  %v164_v24 = vld [vmem:[#allocation5 + $0x2d0] sm:$0xff] }
  0x43   :  { %672 = vmatpush3.msra.mxu1 %v108_v55  ;;  %638 = vmatprep.subr.mxu0 %v91_v56  ;;  %v196_v25 = vld [vmem:[#allocation5 + $0x3d0] sm:$0xff]  ;;  %v163_v28 = vld [vmem:[#allocation5 + $0x2c8] sm:$0xff]  ;;  %v162_v32 = vld [vmem:[#allocation5 + $0x2c0] sm:$0xff] }
  0x44   :  { %673 = vmatprep.subr.mxu1 %v123_v57  ;;  %639 = vmatpush3.msra.mxu0 %v75_v58  ;;  %v148_v26 = vld [vmem:[#allocation5 + $0x250] sm:$0xff]  ;;  %v195_v29 = vld [vmem:[#allocation5 + $0x3c8] sm:$0xff]  ;;  %v194_v33 = vld [vmem:[#allocation5 + $0x3c0] sm:$0xff] }
  0x45   :  { %674 = vmatpush3.msra.mxu1 %v107_v59  ;;  %640 = vmatprep.subr.mxu0 %v90_v60  ;;  %v180_v27 = vld [vmem:[#allocation5 + $0x350] sm:$0xff]  ;;  %v147_v30 = vld [vmem:[#allocation5 + $0x248] sm:$0xff]  ;;  %v146_v34 = vld [vmem:[#allocation5 + $0x240] sm:$0xff] }
  0x46   :  { %675 = vmatprep.subr.mxu1 %v122_v61  ;;  %641 = vmatpush3.msra.mxu0 %v74_v62  ;;  %v179_v31 = vld [vmem:[#allocation5 + $0x348] sm:$0xff]  ;;  %v178_v35 = vld [vmem:[#allocation5 + $0x340] sm:$0xff]  ;;  %v161_v36 = vld [vmem:[#allocation5 + $0x2b8] sm:$0xff] }
  0x47   :  { %266 = vmatprep.mubr.f32.mxu0 %v67_v63  ;;  %676 = vmatpush3.msra.mxu1 %v106_v0  ;;  %v193_v37 = vld [vmem:[#allocation5 + $0x3b8] sm:$0xff]  ;;  %v160_v40 = vld [vmem:[#allocation5 + $0x2b0] sm:$0xff]  ;;  %v159_v44 = vld [vmem:[#allocation5 + $0x2a8] sm:$0xff] }
  0x48   :  { %336 = vmatprep.mubr.f32.mxu1 %v69_v1  ;;  %267 = vmatmul.mubr.f32.vlgmr.msra.gmra.mxu0 %v66_v2  ;;  %v145_v38 = vld [vmem:[#allocation5 + $0x238] sm:$0xff]  ;;  %v192_v41 = vld [vmem:[#allocation5 + $0x3b0] sm:$0xff]  ;;  %v191_v45 = vld [vmem:[#allocation5 + $0x3a8] sm:$0xff] }
  0x49   :  { %337 = vmatmul.mubr.f32.vlgmr.msra.gmra.mxu1 %v68_v3  ;;  %680 = vmatprep.subr.mxu0 %v169_v4  ;;  %v177_v39 = vld [vmem:[#allocation5 + $0x338] sm:$0xff]  ;;  %v144_v42 = vld [vmem:[#allocation5 + $0x230] sm:$0xff]  ;;  %v143_v46 = vld [vmem:[#allocation5 + $0x228] sm:$0xff] }
  0x4a   :  { %715 = vmatprep.subr.mxu1 %v201_v5  ;;  %681 = vmatpush3.msra.mxu0 %v153_v6  ;;  %v176_v43 = vld [vmem:[#allocation5 + $0x330] sm:$0xff]  ;;  %v175_v47 = vld [vmem:[#allocation5 + $0x328] sm:$0xff]  ;;  %v158_v48 = vld [vmem:[#allocation5 + $0x2a0] sm:$0xff] }
  0x4b   :  { %716 = vmatpush3.msra.mxu1 %v185_v7  ;;  %682 = vmatprep.subr.mxu0 %v168_v8  ;;  %v190_v49 = vld [vmem:[#allocation5 + $0x3a0] sm:$0xff]  ;;  %v157_v52 = vld [vmem:[#allocation5 + $0x298] sm:$0xff]  ;;  %v156_v56 = vld [vmem:[#allocation5 + $0x290] sm:$0xff] }
  0x4c   :  { %717 = vmatprep.subr.mxu1 %v200_v9  ;;  %683 = vmatpush3.msra.mxu0 %v152_v10  ;;  %v142_v50 = vld [vmem:[#allocation5 + $0x220] sm:$0xff]  ;;  %v189_v53 = vld [vmem:[#allocation5 + $0x398] sm:$0xff]  ;;  %v188_v57 = vld [vmem:[#allocation5 + $0x390] sm:$0xff]  ;;  %v901_v9 = vmov 0.0  }
  0x4d   :  { %718 = vmatpush3.msra.mxu1 %v184_v11  ;;  %684 = vmatprep.subr.mxu0 %v167_v12  ;;  %v174_v51 = vld [vmem:[#allocation5 + $0x320] sm:$0xff]  ;;  %v141_v54 = vld [vmem:[#allocation5 + $0x218] sm:$0xff]  ;;  %v140_v58 = vld [vmem:[#allocation5 + $0x210] sm:$0xff] }
  0x4e   :  { %719 = vmatprep.subr.mxu1 %v199_v13  ;;  %685 = vmatpush3.msra.mxu0 %v151_v14  ;;  %v173_v55 = vld [vmem:[#allocation5 + $0x318] sm:$0xff]  ;;  %v172_v59 = vld [vmem:[#allocation5 + $0x310] sm:$0xff]  ;;  %v155_v60 = vld [vmem:[#allocation5 + $0x288] sm:$0xff] }
  0x4f   :  { %720 = vmatpush3.msra.mxu1 %v183_v15  ;;  %686 = vmatprep.subr.mxu0 %v166_v16  ;;  %v187_v61 = vld [vmem:[#allocation5 + $0x388] sm:$0xff]  ;;  %v154_v0 = vld [vmem:[#allocation5 + $0x280] sm:$0xff]  ;;  %v73_v5 = vld [vmem:[#allocation2 + $0x38] sm:$0xff] }
  0x50   :  { %721 = vmatprep.subr.mxu1 %v198_v17  ;;  %687 = vmatpush3.msra.mxu0 %v150_v18  ;;  %v139_v62 = vld [vmem:[#allocation5 + $0x208] sm:$0xff]  ;;  %v186_v1 = vld [vmem:[#allocation5 + $0x380] sm:$0xff]  ;;  %v72_v7 = vld [vmem:[#allocation2 + $0x30] sm:$0xff] }
  0x51   :  { %722 = vmatpush3.msra.mxu1 %v182_v19  ;;  %688 = vmatprep.subr.mxu0 %v165_v20  ;;  %v171_v63 = vld [vmem:[#allocation5 + $0x308] sm:$0xff]  ;;  %v138_v2 = vld [vmem:[#allocation5 + $0x200] sm:$0xff]  ;;  %v512_v8 = vld [vmem:[#allocation7 + $0x78] sm:$0xff] }
  0x52   :  { %723 = vmatprep.subr.mxu1 %v197_v21  ;;  %689 = vmatpush3.msra.mxu0 %v149_v22  ;;  %v71_v3 = vld [vmem:[#allocation2 + $0x28] sm:$0xff]  ;;  %v170_v4 = vld [vmem:[#allocation5 + $0x300] sm:$0xff]  ;;  %v511_v10 = vld [vmem:[#allocation7 + $0x70] sm:$0xff] }
  0x53   :  { %724 = vmatpush3.msra.mxu1 %v181_v23  ;;  %690 = vmatprep.subr.mxu0 %v164_v24  ;;  %v70_v6 = vld [vmem:[#allocation2 + $0x20] sm:$0xff]  ;;  %v510_v11 = vld [vmem:[#allocation7 + $0x68] sm:$0xff]  ;;  %v508_v13 = vld [vmem:[#allocation7 + $0x58] sm:$0xff] }
  0x54   :  { %725 = vmatprep.subr.mxu1 %v196_v25  ;;  %691 = vmatpush3.msra.mxu0 %v148_v26  ;;  %v509_v12 = vld [vmem:[#allocation7 + $0x60] sm:$0xff]  ;;  %v507_v14 = vld [vmem:[#allocation7 + $0x50] sm:$0xff]  ;;  %v506_v15 = vld [vmem:[#allocation7 + $0x48] sm:$0xff] }
  0x55   :  { %726 = vmatpush3.msra.mxu1 %v180_v27  ;;  %692 = vmatprep.subr.mxu0 %v163_v28  ;;  %v505_v16 = vld [vmem:[#allocation7 + $0x40] sm:$0xff]  ;;  %v504_v17 = vld [vmem:[#allocation7 + $0x38] sm:$0xff]  ;;  %v503_v18 = vld [vmem:[#allocation7 + $0x30] sm:$0xff] }
  0x56   :  { %727 = vmatprep.subr.mxu1 %v195_v29  ;;  %693 = vmatpush3.msra.mxu0 %v147_v30  ;;  %v502_v19 = vld [vmem:[#allocation7 + $0x28] sm:$0xff]  ;;  %v501_v20 = vld [vmem:[#allocation7 + $0x20] sm:$0xff]  ;;  %v500_v21 = vld [vmem:[#allocation7 + $0x18] sm:$0xff] }
  0x57   :  { %728 = vmatpush3.msra.mxu1 %v179_v31  ;;  %694 = vmatprep.subr.mxu0 %v162_v32  ;;  %v499_v22 = vld [vmem:[#allocation7 + $0x10] sm:$0xff]  ;;  %v498_v23 = vld [vmem:[#allocation7 + $0x8] sm:$0xff]  ;;  %v497_v24 = vld [vmem:[#allocation7] sm:$0xff] }
  0x58   :  { %729 = vmatprep.subr.mxu1 %v194_v33  ;;  %695 = vmatpush3.msra.mxu0 %v146_v34 }
  0x59   :  { %730 = vmatpush3.msra.mxu1 %v178_v35  ;;  %696 = vmatprep.subr.mxu0 %v161_v36 }
  0x5a   :  { %731 = vmatprep.subr.mxu1 %v193_v37  ;;  %697 = vmatpush3.msra.mxu0 %v145_v38 }
  0x5b   :  { %732 = vmatpush3.msra.mxu1 %v177_v39  ;;  %698 = vmatprep.subr.mxu0 %v160_v40  ;;  %v608_v40 = vld [vmem:[%s954_s2] ss:$0 sm:$0xff] }
  0x5c   :  { %733 = vmatprep.subr.mxu1 %v192_v41  ;;  %699 = vmatpush3.msra.mxu0 %v144_v42 }
  0x5d   :  { %734 = vmatpush3.msra.mxu1 %v176_v43  ;;  %700 = vmatprep.subr.mxu0 %v159_v44  ;;  %v609_v43 = vld [vmem:[%s956_s4] ss:$0 sm:$0xff] }
  0x5e   :  { %735 = vmatprep.subr.mxu1 %v191_v45  ;;  %701 = vmatpush3.msra.mxu0 %v143_v46 }
  0x5f   :  { %736 = vmatpush3.msra.mxu1 %v175_v47  ;;  %702 = vmatprep.subr.mxu0 %v158_v48 }
  0x60   :  { %737 = vmatprep.subr.mxu1 %v190_v49  ;;  %703 = vmatpush3.msra.mxu0 %v142_v50 }
  0x61   :  { %738 = vmatpush3.msra.mxu1 %v174_v51  ;;  %704 = vmatprep.subr.mxu0 %v157_v52 }
  0x62   :  { %739 = vmatprep.subr.mxu1 %v189_v53  ;;  %705 = vmatpush3.msra.mxu0 %v141_v54 }
  0x63   :  { %740 = vmatpush3.msra.mxu1 %v173_v55  ;;  %706 = vmatprep.subr.mxu0 %v156_v56 }
  0x64   :  { %741 = vmatprep.subr.mxu1 %v188_v57  ;;  %707 = vmatpush3.msra.mxu0 %v140_v58 }
  0x65   :  { %742 = vmatpush3.msra.mxu1 %v172_v59  ;;  %708 = vmatprep.subr.mxu0 %v155_v60 }
  0x66   :  { %743 = vmatprep.subr.mxu1 %v187_v61  ;;  %709 = vmatpush3.msra.mxu0 %v139_v62 }
  0x67   :  { %744 = vmatpush3.msra.mxu1 %v171_v63  ;;  %710 = vmatprep.subr.mxu0 %v154_v0 }
  0x68   :  { %745 = vmatprep.subr.mxu1 %v186_v1  ;;  %711 = vmatpush3.msra.mxu0 %v138_v2 }
  0x69   :  { %406 = vmatprep.mubr.f32.mxu0 %v71_v3  ;;  %746 = vmatpush3.msra.mxu1 %v170_v4 }
  0x6a   :  { %476 = vmatprep.mubr.f32.mxu1 %v73_v5  ;;  %407 = vmatmul.mubr.f32.vlgmr.msra.gmra.mxu0 %v70_v6 }
  0x6b   :  { %477 = vmatmul.mubr.f32.vlgmr.msra.gmra.mxu1 %v72_v7  ;;  %767 = vmatprep.subr.mxu0 %v901_v9 }
  0x6c   :  { %768 = vmatpush3.msra.mxu0 %v512_v8  ;;  %799 = vmatprep.mubr.msk.f32.mxu0 %vm902_vm0, %v901_v9 }
  0x6d   :  { %769 = vmatprep.subr.mxu0 %v901_v9 }
  0x6e   :  { %770 = vmatpush3.msra.mxu0 %v511_v10 }
  0x6f   :  { %771 = vmatprep.subr.mxu0 %v901_v9 }
  0x70   :  { %772 = vmatpush3.msra.mxu0 %v510_v11 }
  0x71   :  { %773 = vmatprep.subr.mxu0 %v901_v9 }
  0x72   :  { %774 = vmatpush3.msra.mxu0 %v509_v12 }
  0x73   :  { %775 = vmatprep.subr.mxu0 %v901_v9 }
  0x74   :  { %776 = vmatpush3.msra.mxu0 %v508_v13 }
  0x75   :  { %777 = vmatprep.subr.mxu0 %v901_v9 }
  0x76   :  { %778 = vmatpush3.msra.mxu0 %v507_v14 }
  0x77   :  { %779 = vmatprep.subr.mxu0 %v901_v9 }
  0x78   :  { %780 = vmatpush3.msra.mxu0 %v506_v15 }
  0x79   :  { %781 = vmatprep.subr.mxu0 %v901_v9 }
  0x7a   :  { %782 = vmatpush3.msra.mxu0 %v505_v16 }
  0x7b   :  { %783 = vmatprep.subr.mxu0 %v901_v9 }
  0x7c   :  { %784 = vmatpush3.msra.mxu0 %v504_v17 }
  0x7d   :  { %785 = vmatprep.subr.mxu0 %v901_v9 }
  0x7e   :  { %786 = vmatpush3.msra.mxu0 %v503_v18 }
  0x7f   :  { %787 = vmatprep.subr.mxu0 %v901_v9 }
  0x80   :  { %788 = vmatpush3.msra.mxu0 %v502_v19 }
  0x81   :  { %789 = vmatprep.subr.mxu0 %v901_v9 }
  0x82   :  { %790 = vmatpush3.msra.mxu0 %v501_v20 }
  0x83   :  { %791 = vmatprep.subr.mxu0 %v901_v9 }
  0x84   :  { %792 = vmatpush3.msra.mxu0 %v500_v21 }
  0x85   :  { %793 = vmatprep.subr.mxu0 %v901_v9 }
  0x86   :  { %794 = vmatpush3.msra.mxu0 %v499_v22 }
  0x87   :  { %795 = vmatprep.subr.mxu0 %v901_v9 }
  0x88   :  { %796 = vmatpush3.msra.mxu0 %v498_v23 }
  0x89   :  { %797 = vmatprep.subr.mxu0 %v901_v9 }
  0x8a   :  { %798 = vmatpush3.msra.mxu0 %v497_v24 }
 0x108   :  { %v642_v25 = vpop.f32.mrf.mxu0 }
 0x109   :  { %v677_v26 = vpop.f32.mrf.mxu1 }
 0x10a   :  { %v643_v27 = vpop.f32.mrf.mxu0 }
 0x10b   :  { %v678_v28 = vpop.f32.mrf.mxu1  ;;  %v644_v29 = vadd.f32 %v643_v27, %v642_v25 }
 0x10c   :  { %v679_v30 = vadd.f32 %v678_v28, %v677_v26 }
 0x10e   :  { %v339_v35 = vadd.f32 %v679_v30, %v644_v29 }
 0x12a   :  { %v712_v31 = vpop.f32.mrf.mxu0 }
 0x12b   :  { %v747_v32 = vpop.f32.mrf.mxu1 }
 0x12c   :  { %v713_v33 = vpop.f32.mrf.mxu0 }
 0x12d   :  { %v748_v34 = vpop.f32.mrf.mxu1  ;;  %v714_v36 = vadd.f32 %v713_v33, %v712_v31 }
 0x12e   :  { %v749_v38 = vadd.f32 %v748_v34, %v747_v32 }
 0x12f   :  { %v409_v37 = vadd.f32 %v714_v36, %v339_v35 }
 0x131   :  { %v479_v39 = vadd.f32 %v749_v38, %v409_v37 }
 0x133   :  { %v495_v41 = vadd.f32 %v608_v40, %v479_v39 }
 0x135   :  { %v496_v42 = vmax.f32 %v495_v41, 0.0 }
 0x137   :  { %800 = vmatmul.mubr.f32.vlgmr.msra.gmra.mxu0 %v496_v42 }
 0x1f7   :  { %v586_v44 = vpop.f32.mrf.mxu0 }
 0x1f8   :  { %v587_v45 = vadd.f32 %v609_v43, %v586_v44 }
 0x1f9   :  { %v801_v46 = vpop.f32.mrf.mxu0 }
 0x1fa   :  { %v590_v47 = vmax.f32 %v587_v45, 0.0 }
 0x1fc   :  { %591 = vst [vmem:[#allocation8] sm:$0xff] %v590_v47 }
 0x1fd   :  { %881 = shalt.err (!%p878_p5)
}
 0x1fe   :  { %601 = dma.vmem_to_hbm [thread:$0]  %s599_s12, 128, %s957_s5, [#allocation4]  }
 0x1ff   :  { %894 = dma.done.wait [#allocation4], 128  }
 0x200   :  { %895 = vsyncadd [#allocation4], 4294967168 }
 0x201   :  { %605 = vsyncpa [#allocation3], 1 }
 0x202   :  { %606 = vsyncpa [#allocation6], 1 }
 0x203   :  { %607 = vsyncpa [#allocation4], 1 }

</bundles_post_ra>
